<compile_context>
chip_gen: v5e
topology: v5e:2x2
jax: 0.10.0
libtpu: 0.0.40
codegen_flags: <defaults>
</compile_context>

<pallas_src>
import jax
import jax.numpy as jnp
from jax.experimental import pallas as pl
from jax.experimental.pallas import tpu as pltpu


def _round_up(x, m):
    return ((x + m - 1) // m) * m


def _num_tensorcores():
    """TensorCores the 'parallel' dst axis can shard across (megacore)."""
    try:
        kind = jax.devices()[0].device_kind.lower()
    except Exception:
        return 1
    for tag in ("v7", "v5p", "v4"):   # multi-TC / megacore generations
        if tag in kind:
            return 2
    return 1                          # v5e / v6e: single TensorCore


def _vmem_capacity_bytes():
    try:
        return int(pltpu.get_tpu_info().vmem_capacity_bytes)
    except Exception:
        return 128 * 1024 * 1024      # v5e/v6e physical VMEM


def _neighbor_encoder_kernel(adj_ref, emb_ref, out_ref, acc_ref, deg_ref):
    """Grid = (dst_tile [parallel], relation [arbitrary], src_tile [arbitrary]).

    Per relation: acc += A_tile @ E_tile over src tiles, deg += row-sum(A_tile);
    at the last src tile the exact mean (inv-degree * acc) is added into the
    VMEM-resident output tile.  Output read-modify-write happens once per relation.
    """
    r = pl.program_id(1)
    k = pl.program_id(2)
    k_last = pl.num_programs(2) - 1

    @pl.when((r == 0) & (k == 0))
    def _():
        out_ref[...] = jnp.zeros_like(out_ref)

    @pl.when(k == 0)
    def _():
        acc_ref[...] = jnp.zeros_like(acc_ref)
        deg_ref[...] = jnp.zeros_like(deg_ref)

    # int8 0/1 adjacency -> bf16 on the VPU (exact); MXU accumulates in f32.
    a = adj_ref[...].astype(jnp.bfloat16)                           # (tm, tk)
    acc_ref[...] += jnp.dot(a, emb_ref[...],
                            preferred_element_type=jnp.float32)     # (tm, Dp)
    # In-degree partial: exact f32 row-sum of 0/1 values (XLU reduce).
    deg_ref[...] += jnp.sum(a.astype(jnp.float32), axis=-1, keepdims=True)

    @pl.when(k == k_last)
    def _():
        deg = deg_ref[...]                                          # (tm, 1)
        inv = jnp.where(deg > 0.0, 1.0 / jnp.maximum(deg, 1.0), 0.0)  # exact divide
        out_ref[...] += inv * acc_ref[...]


def neighbor_encoder(adj, entity_emb, *, tm=1024, tk=2048):
    """adj: (R, N, N) dense 0/1 per-relation adjacency (dst, src); int8 preferred.
       entity_emb: (N, D).  Returns (N, D) float32."""
    R, N, N2 = adj.shape
    assert N == N2, "adjacency must be square per relation"
    _, D = entity_emb.shape
    Dp = _round_up(D, 128)            # lane-dense output width

    n_cores = _num_tensorcores()

    # dst tile: multiple of 32 (int8 sublane packing); src tile: multiple of 128.
    tm = _round_up(min(tm, _round_up(N, 32)), 32)
    tk = _round_up(min(tk, _round_up(N, 128)), 128)

    # Multi-TC parts: make sure the parallel dst axis has >= n_cores tiles.
    if n_cores > 1:
        while _round_up(N, tm) // tm < n_cores and tm > 32:
            tm = _round_up(max(32, tm // 2), 32)

    # Generation-aware VMEM budget (leave ~25% headroom for compiler scratch).
    budget = (_vmem_capacity_bytes() * 3) // 4

    def est(tm_, tk_):
        return (2 * tm_ * tk_ * 1          # adj int8 tile, double-buffered
                + 2 * tk_ * Dp * 2         # emb bf16 tile, double-buffered
                + 2 * tm_ * Dp * 4         # f32 resident output tile
                + tm_ * Dp * 4             # f32 scratch accumulator
                + tm_ * 128 * 4            # (tm,1) degree scratch, lane-padded
                + tm_ * tk_ * (2 + 4))     # in-kernel bf16 cast + f32 row-sum temps

    while est(tm, tk) > budget and tk > 128:
        tk = _round_up(max(128, tk // 2), 128)
    while est(tm, tk) > budget and tm > 32:
        tm = _round_up(max(32, tm // 2), 32)

    Nd = _round_up(N, tm)             # padded dst extent
    Ns = _round_up(N, tk)             # padded src extent

    # Adjacency HBM stream: int8.  Zero-copy fast path when already tile-aligned
    # int8 (the recommended storage format); otherwise a single cast/pad pass.
    if adj.dtype == jnp.int8 and Nd == N and Ns == N:
        adj_p = adj
    else:
        adj_p = jnp.zeros((R, Nd, Ns), jnp.int8).at[:, :N, :N].set(
            adj.astype(jnp.int8))

    # Embedding streamed in bf16 (only the embedding values are rounded).
    if entity_emb.dtype == jnp.bfloat16 and Ns == N and Dp == D:
        emb_p = entity_emb
    else:
        emb_p = jnp.zeros((Ns, Dp), jnp.bfloat16).at[:N, :D].set(
            entity_emb.astype(jnp.bfloat16))

    grid = (Nd // tm, R, Ns // tk)
    vmem_limit = int(min(budget, max(32 * 1024 * 1024, 2 * est(tm, tk))))

    out_p = pl.pallas_call(
        _neighbor_encoder_kernel,
        out_shape=jax.ShapeDtypeStruct((Nd, Dp), jnp.float32),
        grid_spec=pltpu.PrefetchScalarGridSpec(
            num_scalar_prefetch=0,
            grid=grid,
            in_specs=[
                # adjacency tile for (relation r, dst tile i, src tile k), int8
                pl.BlockSpec((None, tm, tk), lambda i, r, k: (r, i, k)),
                # embedding rows for src tile k, bf16
                pl.BlockSpec((tk, Dp), lambda i, r, k: (k, 0)),
            ],
            # constant index across (r, k) -> VMEM-resident output accumulator
            out_specs=pl.BlockSpec((tm, Dp), lambda i, r, k: (i, 0)),
            scratch_shapes=[
                pltpu.VMEM((tm, Dp), jnp.float32),   # per-relation accumulator
                pltpu.VMEM((tm, 1), jnp.float32),    # per-relation in-degree
            ],
        ),
        compiler_params=pltpu.CompilerParams(
            dimension_semantics=("parallel", "arbitrary", "arbitrary"),
            vmem_limit_bytes=vmem_limit,
        ),
    )(adj_p, emb_p)

    return out_p[:N, :D]


def neighbor_encoder_ref(adj, entity_emb):
    """Pure-JAX reference matching DGL update_all(copy_u, mean) summed over relations."""
    adj = adj.astype(jnp.float32)
    emb = entity_emb.astype(jnp.float32)
    deg = adj.sum(axis=-1, keepdims=True)                          # (R, N, 1)
    agg = jnp.einsum("rds,sk->rdk", adj, emb)                      # (R, N, D)
    mean = jnp.where(deg > 0.0, agg / jnp.maximum(deg, 1.0), 0.0)
    return mean.sum(axis=0)


if __name__ == "__main__":
    # Small synthetic KGIN-style graph: 256 entities, 64-dim, 4 relations.
    # tm=tk=128 so dst/src tiling is exercised: grid = (2, 4, 2); D=64 exercises
    # lane padding of the embedding/output.
    n_entities, dim, n_relations = 256, 64, 4

    key = jax.random.PRNGKey(0)
    k_adj, k_emb = jax.random.split(key)

    # Sparse-ish 0/1 adjacency per relation, stored directly as int8 (the
    # zero-copy fast path); includes zero-in-degree nodes.
    adj = (jax.random.uniform(k_adj, (n_relations, n_entities, n_entities))
           < 0.05).astype(jnp.int8)
    entity_emb = jax.random.normal(k_emb, (n_entities, dim), dtype=jnp.float32)

    out = neighbor_encoder(adj, entity_emb, tm=128, tk=128)
    out = jax.block_until_ready(out)

    # The kernel streams the embedding in bf16 (adjacency/degree are exact);
    # compare against the reference evaluated on the identically-rounded embedding.
    emb_bf16 = entity_emb.astype(jnp.bfloat16).astype(jnp.float32)
    ref = neighbor_encoder_ref(adj, emb_bf16)

    assert out.shape == (n_entities, dim)
    assert jnp.allclose(out, ref, atol=1e-4, rtol=1e-4), "mismatch vs reference"

    print("KERNEL_OK")
</pallas_src>

<mosaic_0001>
module attributes {stable_mosaic.version = 11 : i64} {
  func.func @_neighbor_encoder_kernel(%arg0: i32, %arg1: i32, %arg2: i32, %arg3: memref<1x128x128xi8, #tpu.memory_space<vmem>>, %arg4: memref<128x128xbf16, #tpu.memory_space<vmem>>, %arg5: memref<128x128xf32, #tpu.memory_space<vmem>>, %arg6: memref<128x128xf32, #tpu.memory_space<vmem>>, %arg7: memref<128x1xf32, #tpu.memory_space<vmem>>) attributes {dimension_semantics = [#tpu.dimension_semantics<parallel>, #tpu.dimension_semantics<arbitrary>, #tpu.dimension_semantics<arbitrary>], iteration_bounds = array<i64: 2, 4, 2>, scalar_prefetch = 0 : i64, scratch_operands = 2 : i64, tpu.core_type = #tpu.core_type<tc>, window_params = [{transform_indices = @transform_0, window_bounds = array<i64: 1, 128, 128>}, {transform_indices = @transform_1, window_bounds = array<i64: 128, 128>}, {transform_indices = @transform_2, window_bounds = array<i64: 128, 128>}]} {
    %c0_i32 = arith.constant 0 : i32
    %0 = arith.cmpi eq, %arg1, %c0_i32 : i32
    %c0_i32_0 = arith.constant 0 : i32
    %1 = arith.cmpi eq, %arg2, %c0_i32_0 : i32
    %2 = arith.andi %0, %1 : i1
    %3 = arith.extui %2 : i1 to i32
    %c0_i32_1 = arith.constant 0 : i32
    %4 = arith.cmpi ne, %3, %c0_i32_1 : i32
    scf.if %4 {
      %cst_18 = arith.constant 0.000000e+00 : f32
      %25 = vector.broadcast %cst_18 : f32 to vector<128x128xf32>
      %c0_19 = arith.constant 0 : index
      %c0_20 = arith.constant 0 : index
      %26 = vector.load %arg5[%c0_19, %c0_20] : memref<128x128xf32, #tpu.memory_space<vmem>>, vector<128x128xf32>
      tpu.vector_store %arg5[%c0_19, %c0_20], %25 {strides = array<i32>} : memref<128x128xf32, #tpu.memory_space<vmem>>, vector<128x128xf32>,
    } else {
    }
    %c0_i32_2 = arith.constant 0 : i32
    %5 = arith.cmpi eq, %arg2, %c0_i32_2 : i32
    %6 = arith.extui %5 : i1 to i32
    %c0_i32_3 = arith.constant 0 : i32
    %7 = arith.cmpi ne, %6, %c0_i32_3 : i32
    scf.if %7 {
      %cst_18 = arith.constant 0.000000e+00 : f32
      %25 = vector.broadcast %cst_18 : f32 to vector<128x128xf32>
      %c0_19 = arith.constant 0 : index
      %c0_20 = arith.constant 0 : index
      %26 = vector.load %arg6[%c0_19, %c0_20] : memref<128x128xf32, #tpu.memory_space<vmem>>, vector<128x128xf32>
      tpu.vector_store %arg6[%c0_19, %c0_20], %25 {strides = array<i32>} : memref<128x128xf32, #tpu.memory_space<vmem>>, vector<128x128xf32>,
      %cst_21 = arith.constant 0.000000e+00 : f32
      %27 = vector.broadcast %cst_21 : f32 to vector<128x1xf32>
      %c0_22 = arith.constant 0 : index
      %c0_23 = arith.constant 0 : index
      %28 = vector.load %arg7[%c0_22, %c0_23] : memref<128x1xf32, #tpu.memory_space<vmem>>, vector<128x1xf32>
      tpu.vector_store %arg7[%c0_22, %c0_23], %27 {strides = array<i32>} : memref<128x1xf32, #tpu.memory_space<vmem>>, vector<128x1xf32>,
    } else {
    }
    %c0 = arith.constant 0 : index
    %c0_4 = arith.constant 0 : index
    %c0_5 = arith.constant 0 : index
    %8 = vector.load %arg3[%c0, %c0_4, %c0_5] : memref<1x128x128xi8, #tpu.memory_space<vmem>>, vector<1x128x128xi8>
    %9 = vector.shape_cast %8 : vector<1x128x128xi8> to vector<128x128xi8>
    %10 = arith.sitofp %9 : vector<128x128xi8> to vector<128x128xbf16>
    %c0_6 = arith.constant 0 : index
    %c0_7 = arith.constant 0 : index
    %11 = vector.load %arg6[%c0_6, %c0_7] : memref<128x128xf32, #tpu.memory_space<vmem>>, vector<128x128xf32>
    %c0_8 = arith.constant 0 : index
    %c0_9 = arith.constant 0 : index
    %12 = vector.load %arg4[%c0_8, %c0_9] : memref<128x128xbf16, #tpu.memory_space<vmem>>, vector<128x128xbf16>
    %cst = arith.constant dense<0.000000e+00> : vector<128x128xf32>
    %13 = tpu.matmul %10, %12, %cst {dimension_numbers = #tpu.dot_dimension_numbers<[1], [0], [0], [1], [0, 0, 1, 1], [], []>} : vector<128x128xbf16>, vector<128x128xbf16>, vector<128x128xf32> -> vector<128x128xf32>
    %14 = arith.addf %11, %13 : vector<128x128xf32>
    %c0_10 = arith.constant 0 : index
    %c0_11 = arith.constant 0 : index
    %15 = vector.load %arg6[%c0_10, %c0_11] : memref<128x128xf32, #tpu.memory_space<vmem>>, vector<128x128xf32>
    tpu.vector_store %arg6[%c0_10, %c0_11], %14 {strides = array<i32>} : memref<128x128xf32, #tpu.memory_space<vmem>>, vector<128x128xf32>,
    %c0_12 = arith.constant 0 : index
    %c0_13 = arith.constant 0 : index
    %16 = vector.load %arg7[%c0_12, %c0_13] : memref<128x1xf32, #tpu.memory_space<vmem>>, vector<128x1xf32>
    %17 = arith.extf %10 : vector<128x128xbf16> to vector<128x128xf32>
    %cst_14 = arith.constant dense<0.000000e+00> : vector<128xf32>
    %18 = vector.multi_reduction <add>, %17, %cst_14 [1] : vector<128x128xf32> to vector<128xf32>
    %19 = vector.shape_cast %18 : vector<128xf32> to vector<128x1xf32>
    %20 = arith.addf %16, %19 : vector<128x1xf32>
    %c0_15 = arith.constant 0 : index
    %c0_16 = arith.constant 0 : index
    %21 = vector.load %arg7[%c0_15, %c0_16] : memref<128x1xf32, #tpu.memory_space<vmem>>, vector<128x1xf32>
    tpu.vector_store %arg7[%c0_15, %c0_16], %20 {strides = array<i32>} : memref<128x1xf32, #tpu.memory_space<vmem>>, vector<128x1xf32>,
    %c1_i32 = arith.constant 1 : i32
    %22 = arith.cmpi eq, %arg2, %c1_i32 : i32
    %23 = arith.extui %22 : i1 to i32
    %c0_i32_17 = arith.constant 0 : i32
    %24 = arith.cmpi ne, %23, %c0_i32_17 : i32
    scf.if %24 {
      %c0_18 = arith.constant 0 : index
      %c0_19 = arith.constant 0 : index
      %25 = vector.load %arg7[%c0_18, %c0_19] : memref<128x1xf32, #tpu.memory_space<vmem>>, vector<128x1xf32>
      %cst_20 = arith.constant 0.000000e+00 : f32
      %26 = vector.broadcast %cst_20 : f32 to vector<128x1xf32>
      %27 = arith.cmpf ogt, %25, %26 : vector<128x1xf32>
      %cst_21 = arith.constant 1.000000e+00 : f32
      %28 = vector.broadcast %cst_21 : f32 to vector<128x1xf32>
      %29 = arith.maximumf %25, %28 : vector<128x1xf32>
      %cst_22 = arith.constant 1.000000e+00 : f32
      %30 = vector.broadcast %cst_22 : f32 to vector<128x1xf32>
      %31 = arith.divf %30, %29 : vector<128x1xf32>
      %cst_23 = arith.constant 0.000000e+00 : f32
      %32 = vector.broadcast %cst_23 : f32 to vector<128x1xf32>
      %33 = arith.select %27, %31, %32 : vector<128x1xi1>, vector<128x1xf32>
      %c0_24 = arith.constant 0 : index
      %c0_25 = arith.constant 0 : index
      %34 = vector.load %arg5[%c0_24, %c0_25] : memref<128x128xf32, #tpu.memory_space<vmem>>, vector<128x128xf32>
      %c0_26 = arith.constant 0 : index
      %c0_27 = arith.constant 0 : index
      %35 = vector.load %arg6[%c0_26, %c0_27] : memref<128x128xf32, #tpu.memory_space<vmem>>, vector<128x128xf32>
      %36 = vector.broadcast %33 : vector<128x1xf32> to vector<128x128xf32>
      %37 = arith.mulf %36, %35 : vector<128x128xf32>
      %38 = arith.addf %34, %37 : vector<128x128xf32>
      %c0_28 = arith.constant 0 : index
      %c0_29 = arith.constant 0 : index
      %39 = vector.load %arg5[%c0_28, %c0_29] : memref<128x128xf32, #tpu.memory_space<vmem>>, vector<128x128xf32>
      tpu.vector_store %arg5[%c0_28, %c0_29], %38 {strides = array<i32>} : memref<128x128xf32, #tpu.memory_space<vmem>>, vector<128x128xf32>,
    } else {
    }
    return
  }
  func.func @transform_0(%arg0: i32, %arg1: i32, %arg2: i32) -> (i32, i32, i32) {
    %c0_i32 = arith.constant 0 : i32
    return %arg1, %arg0, %arg2 : i32, i32, i32
  }
  func.func @transform_1(%arg0: i32, %arg1: i32, %arg2: i32) -> (i32, i32) {
    %c0_i32 = arith.constant 0 : i32
    %c0_i32_0 = arith.constant 0 : i32
    return %arg2, %c0_i32 : i32, i32
  }
  func.func @transform_2(%arg0: i32, %arg1: i32, %arg2: i32) -> (i32, i32) {
    %c0_i32 = arith.constant 0 : i32
    %c0_i32_0 = arith.constant 0 : i32
    return %arg0, %c0_i32 : i32, i32
  }
}

</mosaic_0001>

<bundles_post_ra>
// kernel: tpu_custom_call.1
= control target key start
LH: loop header
LB: loop body
LE: loop exit
PB: predicated region body
PF: predicated region fallthrough
CT: control target
= control target key end

     0   :  { %s2456_s0 = inlined_call_operand.hbm [shape: s8[4,256,256], index: 0, kind: input, shape index: {}]   ;;  %s2457_s1 = inlined_call_operand.hbm [shape: bf16[256,128], index: 1, kind: input, shape index: {}]   ;;  %s2458_s2 = inlined_call_operand.hbm [shape: f32[256,128], index: 2, kind: output, shape index: {}]  }
   0x1   :  { %2466 = sst [smem:[#allocation23_spill]] %s2456_s0 }
   0x2   :  { %2467 = sst [smem:[#allocation24_spill]] %s2457_s1 }
   0x3   :  { %2468 = sst [smem:[#allocation25_spill]] %s2458_s2 }
   0x4   :  { %7 = vsyncpa [#allocation5], 0 }
   0x5   :  { %9 = vsyncpa [#allocation5 + $0x1], 0 }
   0x6   :  { %10 = vsyncpa [#allocation8], 0 }
   0x7   :  { %12 = vsyncpa [#allocation8 + $0x1], 0 }
   0x8   :  { %13 = vsyncpa [#allocation6], 0 }
   0x9   :  { %15 = vsyncpa [#allocation6 + $0x1], 0  ;;  %s1732_s9 = smov 0   ;;  %s1734_s10 = smov 0  }
   0xa   :  { %s1736_s11 = smov 0   ;;  %s1738_s12 = smov 0  }
   0xb   :  { %s1740_s13 = smov 0   ;;  %s1742_s14 = smov 0  }
   0xc   :  { %s1744_s15 = smov 0   ;;  %s1746_s16 = smov 0  }
   0xd   :  { %s1748_s17 = smov 0   ;;  %s1750_s18 = smov 0  }
   0xe   :  { %s1752_s19 = smov 0   ;;  %s1754_s20 = smov 0  }
   0xf   :  { %s1756_s21 = smov 0   ;;  %s1758_s22 = smov 0  }
  0x10   :  { %s1760_s23 = smov 0   ;;  %s1762_s24 = smov 0  }
  0x11 LB: > { %2469 = sst [smem:[#allocation13_spill]] %s1645_s9  ;;  %s33_s25 = sadd.s32 1, %s1693_s21  ;;  %s1705_s24 = sphi %s1762_s24, %s21_s24   ;;  %s1701_s23 = sphi %s1760_s23, %s2559_s23   ;;  %s1697_s22 = sphi %s1758_s22, %s2572_s22   ;;  %s1693_s21 = sphi %s1756_s21, %s2571_s21   ;;  %s1689_s20 = sphi %s1754_s20, %s2556_s20   ;;  %s1685_s19 = sphi %s1752_s19, %s2570_s19   ;;  %s1681_s18 = sphi %s1750_s18, %s2569_s18   ;;  %s1677_s17 = sphi %s1748_s17, %s2568_s17   ;;  %s1673_s16 = sphi %s1746_s16, %s2567_s16   ;;  %s1669_s15 = sphi %s1744_s15, %s2566_s15   ;;  %s1665_s14 = sphi %s1742_s14, %s2565_s14   ;;  %s1661_s13 = sphi %s1740_s13, %s2564_s13   ;;  %s1657_s12 = sphi %s1738_s12, %s2563_s12   ;;  %s1653_s11 = sphi %s1736_s11, %s2562_s11   ;;  %s1649_s10 = sphi %s1734_s10, %s2561_s10   ;;  %s1645_s9 = sphi %s1732_s9, %s2554_s9  }
  0x12   : > { %2470 = sst [smem:[#allocation14_spill]] %s1649_s10  ;;  %s36_s26 = sadd.s32 1, %s1697_s22 }
  0x13   : > { %2471 = sst [smem:[#allocation15_spill]] %s1657_s12  ;;  %p34_p0 = scmp.ge.s32.totalorder %s33_s25, 2 }
  0x14   : > { %2472 = sst [smem:[#allocation16_spill]] %s1681_s18  ;;  %s40_s27 = sadd.s32 1, %s1701_s23 }
  0x15   : > { %2473 = sst [smem:[#allocation17_spill]] %s1685_s19  ;;  %s51_s28 = sadd.s32 1, %s1677_s17 }
  0x16   : > { %2474 = sst [smem:[#allocation18_spill]] %s1689_s20  ;;  %p58_p1 = scmp.ne.s32.totalorder %s1677_s17, %s1673_s16 }
  0x17   : > { %2475 = sst [smem:[#allocation19_spill]] %s1701_s23  ;;  %s2574_s25 = smov (%p34_p0, %s33_s25), 0 }
  0x18   : > { %2476 = sst [smem:[#allocation20_spill]] %s2574_s25  ;;  %s2576_s26 = smov (!%p34_p0, %s36_s26), %s1697_s22 }
  0x19   : > { %s1823_s29 = ssub.s32 %s1693_s21, %s2574_s25  ;;  %p59_p2 = scmp.eq.s32.totalorder %s1705_s24, 0 }
  0x1a   : > { %p38_p3 = scmp.ge.s32.totalorder %s2576_s26, 4  ;;  %p64_p4 = scmp.ne.s32.totalorder %s1673_s16, %s1669_s15 }
  0x1b   : > { %p1830_p5 = por %p59_p2, %p58_p1  ;;  %s103_s3 = sadd.s32 1, %s1653_s11 }
  0x1c   : > { %s2578_s26 = smov (%p38_p3, %s2576_s26), 0  ;;  %s2580_s27 = smov (!%p38_p3, %s40_s27), %s1701_s23 }
  0x1d   : > { %2478 = sst [smem:[#allocation21_spill]] %s2578_s26  ;;  %s44_s4 = ssub.s32 %s1697_s22, %s2578_s26 }
  0x1e   : > { %p42_p6 = scmp.ge.s32.totalorder %s2580_s27, 2  ;;  %p1304_p7 = scmp.lt.s32.totalorder %s1705_s24, 16 }
  0x1f   : > { %s140_s5 = sand.u32 1, %s1677_s17   ;;  %s1252_s6 = sshll.u32 %s1701_s23, 3 }
  0x20   : > { %s2582_s27 = smov (%p42_p6, %s2580_s27), 0  ;;  %s1201_s7 = sshll.u32 %s140_s5, 5 }
  0x21   : > { %2479 = sst [smem:[#allocation22_spill]] %s2582_s27  ;;  %s45_s8 = ssub.s32 %s1701_s23, %s2582_s27 }
  0x22   : > { %s46_s25 = sor.u32 %s45_s8, %s44_s4  ;;  %p101_p8 = scmp.eq.s32.totalorder %s45_s8, 0 }
  0x23   : > { %s48_s2 = sor.u32 %s1823_s29, %s46_s25  ;;  %s149_s20 = sadd.s32 %s1693_s21, %s1252_s6 }
  0x24   : > { %p49_p9 = scmp.eq.s32.totalorder %s48_s2, 0  ;;  %s1204_s18 = sshll.u32 %s1697_s22, 4 }
  0x25   : > { %s1851_s19 = scalar_select %p101_p8, %s1653_s11, %s103_s3  }
  0x26   : > { %s1854_s26 = scalar_select %p49_p9, %s1677_s17, %s51_s28  }
  0x27   : > { %s151_s1 = sadd.s32 %s1204_s18, %s149_s20  ;;  %s144_s9 = scalar_lea.vmem [#allocation4], %s1201_s7 }
  0x28   : > { %s156_s10 = sshll.u32 %s144_s9, 4  ;;  %s1205_s12 = sshll.u32 %s151_s1, 3  ;;  %s157_s10 = int_to_ptr.vmem [resolvable:$true] %s156_s10 }
  0x29   : > { %s2480_s0 = sld [smem:[#allocation23_spill]]  ;;  %p1294_p10 = pnand %p1304_p7, %p1830_p5 }
  0x2a   : > { %s141_s9 = scalar_lea.sflag [#allocation5], %s140_s5  ;;  %s1707_s1 = smov 256  }
  0x2b   : > { %s2481_s18 = sld [smem:[#allocation15_spill]]  ;;  %s1708_s20 = smov 128  }
  0x2c   : > { %s2482_s27 = sld [smem:[#allocation14_spill]]  ;;  %p1209_p11 = scmp.ge.s32.totalorder %s1705_s24, 1 }
  0x2d   : > { %s2483_s28 = sld [smem:[#allocation13_spill]]  ;;  %p186_p12 = scmp.lt.s32.totalorder %s1705_s24, 17 }
  0x2e   : > { %s1197_s3 = sadd.s32 4294967295, %s1705_s24   ;;  %s1198_s5 = sadd.s32 4294967294, %s1705_s24  }
  0x2f   : > { %s153_s25 = scalar_lea.hbm %s2480_s0, %s1205_s12  ;;  %s1709_s12 = smov 8  }
  0x30   : > { %s154_s2 = sshll.u32 %s153_s25, 4  ;;  %p1865_p13 = pnand %p1209_p11, %p186_p12  ;;  %s155_s2 = int_to_ptr.hbm [resolvable:$true] %s154_s2 }
  0x31   : > { %1296 = dma.hbm_to_vmem [thread:$0]  (!%p1294_p10), %s155_s2, 512, %s157_s10, %s141_s9, %s1707_s1, %s1708_s20, %s1709_s12  }
  0x32   : > { %p65_p0 = scmp.eq.s32.totalorder %s1197_s3, 0  ;;  %p75_p1 = scmp.eq.s32.totalorder %s1823_s29, 0 }
  0x33   : > { %s77_s6 = sadd.s32 1, %s1665_s14  ;;  %p84_p5 = scmp.ne.s32.totalorder %s1665_s14, %s1661_s13 }
  0x34   : > { %p1876_p3 = por %p65_p0, %p64_p4  ;;  %p90_p8 = scmp.ne.s32.totalorder %s1661_s13, %s2481_s18 }
  0x35   : > { %s1883_s10 = scalar_select %p75_p1, %s1665_s14, %s77_s6  }
  0x36   : > { %p1887_p6 = por %p84_p5, %p59_p2  ;;  %p113_p9 = scmp.ne.s32.totalorder %s1653_s11, %s2482_s27 }
  0x37   : > { %p114_p10 = scmp.eq.s32.totalorder %s1197_s3, 15  ;;  %p1895_p11 = por %p90_p8, %p65_p0 }
  0x38   : > { %p119_p4 = scmp.ne.s32.totalorder %s2482_s27, %s2483_s28  ;;  %p120_p1 = scmp.eq.s32.totalorder %s1198_s5, 15 }
  0x39   : > { %p1901_p12 = por %p114_p10, %p113_p9  ;;  %s166_s4 = sand.u32 1, %s1665_s14  }
  0x3a   : > { %s1253_s25 = sshll.u32 %s1693_s21, 6  ;;  %p1907_p2 = por %p120_p1, %p119_p4 }
  0x3b   : > { %s1206_s9 = sshll.u32 %s166_s4, 6  ;;  %s2490_s20 = sld [smem:[#allocation24_spill]] }
  0x3c   : > { %s170_s6 = scalar_lea.vmem [#allocation7], %s1206_s9  ;;  %p1297_p0 = pnand %p1304_p7, %p1887_p6 }
  0x3d   : > { %s178_s27 = sshll.u32 %s170_s6, 4  ;;  %s167_s28 = scalar_lea.sflag [#allocation8], %s166_s4  ;;  %s179_s27 = int_to_ptr.vmem [resolvable:$true] %s178_s27 }
  0x3e   : > { %s1710_s5 = smov 64   ;;  %s1711_s0 = smov 4  }
  0x3f   : > { %190 = sbr.rel (%p1865_p13) target bundleno = 564 (0x234), region = 28  ;;  %s192_s23 = sand.u32 (!%p1865_p13), 1, %s1673_s16  }
  0x40   : > { %s1210_s1 = sshll.u32 (!%p1865_p13), %s192_s23, 5 }
  0x41   : > { %s175_s12 = scalar_lea.hbm %s2490_s20, %s1253_s25  ;;  %s193_s25 = scalar_lea.sflag (!%p1865_p13), [#allocation5], %s192_s23 }
  0x42   : > { %s176_s3 = sshll.u32 %s175_s12, 4  ;;  %s1921_s18 = scalar_lea.vmem (!%p1865_p13), [#allocation4], %s1210_s1  ;;  %s177_s3 = int_to_ptr.hbm [resolvable:$true] %s176_s3 }
  0x43   : > { %1299 = dma.hbm_to_vmem [thread:$0]  (!%p1297_p0), %s177_s3, 1024, %s179_s27, %s167_s28, %s1710_s5, %s1710_s5, %s1711_s0  }
  0x44   : > { %1632 = dma.done.wait (%p1876_p3), %s193_s25, 512  }
  0x45   : > { %1634 = vsyncadd (%p1876_p3), %s193_s25, 4294966784  ;;  %s202_s8 = sand.u32 1, %s1661_s13  }
  0x46   : > { %s1211_s4 = sshll.u32 %s202_s8, 6  ;;  %s203_s0 = scalar_lea.sflag [#allocation8], %s202_s8 }
  0x47   : > { %s1928_s9 = scalar_lea.vmem [#allocation7], %s1211_s4 }
  0x48   : > { %1636 = dma.done.wait (%p1895_p11), %s203_s0, 1024  }
  0x49   : > { %1638 = vsyncadd (%p1895_p11), %s203_s0, 4294966272  ;;  %s2491_s23 = sld [smem:[#allocation14_spill]] }
  0x4a   : > { %s2492_s30 = sld [smem:[#allocation17_spill]] }
  0x4b   : > { %s2493_s20 = sld [smem:[#allocation16_spill]] }
  0x4f   : > { %s230_s12 = sand.u32 1, %s2491_s23  }
  0x50   : > { %p236_p7 = scmp.eq.s32.totalorder %s2492_s30, 0  ;;  %s1212_s7 = sshll.u32 %s230_s12, 7 }
  0x51   : > { %p237_p13 = scmp.eq.s32.totalorder %s2493_s20, 0  ;;  %s1939_s3 = scalar_lea.vmem [#allocation9], %s1212_s7 }
  0x53   : > { %p238_p3 = pnand %p237_p13, %p236_p7 }
  0x55   : > { %241 = sbr.rel (%p238_p3) target bundleno = 107 (0x6b), region = 40 }
  0x5a   : > { %v1712_v0 = vmov 0.0  }
  0x5b   : > { %242 = vst [vmem:[%s1939_s3] sm:$0xff] %v1712_v0 }
  0x5c   : > { %243 = vst [vmem:[%s1939_s3 + $0x8] sm:$0xff] %v1712_v0 }
  0x5d   : > { %244 = vst [vmem:[%s1939_s3 + $0x10] sm:$0xff] %v1712_v0 }
  0x5e   : > { %245 = vst [vmem:[%s1939_s3 + $0x18] sm:$0xff] %v1712_v0 }
  0x5f   : > { %246 = vst [vmem:[%s1939_s3 + $0x20] sm:$0xff] %v1712_v0 }
  0x60   : > { %247 = vst [vmem:[%s1939_s3 + $0x28] sm:$0xff] %v1712_v0 }
  0x61   : > { %248 = vst [vmem:[%s1939_s3 + $0x30] sm:$0xff] %v1712_v0 }
  0x62   : > { %249 = vst [vmem:[%s1939_s3 + $0x38] sm:$0xff] %v1712_v0 }
  0x63   : > { %250 = vst [vmem:[%s1939_s3 + $0x40] sm:$0xff] %v1712_v0 }
  0x64   : > { %251 = vst [vmem:[%s1939_s3 + $0x48] sm:$0xff] %v1712_v0 }
  0x65   : > { %252 = vst [vmem:[%s1939_s3 + $0x50] sm:$0xff] %v1712_v0 }
  0x66   : > { %253 = vst [vmem:[%s1939_s3 + $0x58] sm:$0xff] %v1712_v0 }
  0x67   : > { %254 = vst [vmem:[%s1939_s3 + $0x60] sm:$0xff] %v1712_v0 }
  0x68   : > { %255 = vst [vmem:[%s1939_s3 + $0x68] sm:$0xff] %v1712_v0 }
  0x69   : > { %256 = vst [vmem:[%s1939_s3 + $0x70] sm:$0xff] %v1712_v0 }
  0x6a   : > { %257 = vst [vmem:[%s1939_s3 + $0x78] sm:$0xff] %v1712_v0 }
  0x6b PF: > { %s2494_s29 = sld [smem:[#allocation16_spill]] }
  0x71   : > { %p1213_p5 = scmp.ne.s32.totalorder %s2494_s29, 0 }
  0x73   : > { %260 = sbr.rel (%p1213_p5) target bundleno = 153 (0x99), region = 44 }
  0x78   : > { %v1713_v1 = vmov 0.0   ;;  %vm277_vm0 = vcmask 7168  }
  0x79   : > { %261 = vst [vmem:[#allocation2 + $0x30] sm:$0xff] %v1713_v1 }
  0x7a   : > { %262 = vst [vmem:[#allocation2] sm:$0xff] %v1713_v1 }
  0x7b   : > { %263 = vst [vmem:[#allocation2 + $0x58] sm:$0xff] %v1713_v1 }
  0x7c   : > { %264 = vst [vmem:[#allocation2 + $0x18] sm:$0xff] %v1713_v1 }
  0x7d   : > { %265 = vst [vmem:[#allocation2 + $0x50] sm:$0xff] %v1713_v1 }
  0x7e   : > { %266 = vst [vmem:[#allocation2 + $0x68] sm:$0xff] %v1713_v1 }
  0x7f   : > { %267 = vst [vmem:[#allocation2 + $0x8] sm:$0xff] %v1713_v1 }
  0x80   : > { %268 = vst [vmem:[#allocation2 + $0x48] sm:$0xff] %v1713_v1 }
  0x81   : > { %269 = vst [vmem:[#allocation2 + $0x40] sm:$0xff] %v1713_v1 }
  0x82   : > { %270 = vst [vmem:[#allocation2 + $0x20] sm:$0xff] %v1713_v1 }
  0x83   : > { %271 = vst [vmem:[#allocation2 + $0x10] sm:$0xff] %v1713_v1 }
  0x84   : > { %272 = vst [vmem:[#allocation2 + $0x38] sm:$0xff] %v1713_v1 }
  0x85   : > { %273 = vst [vmem:[#allocation2 + $0x60] sm:$0xff] %v1713_v1 }
  0x86   : > { %274 = vst [vmem:[#allocation2 + $0x70] sm:$0xff] %v1713_v1 }
  0x87   : > { %275 = vst [vmem:[#allocation2 + $0x78] sm:$0xff] %v1713_v1 }
  0x88   : > { %276 = vst [vmem:[#allocation2 + $0x28] sm:$0xff] %v1713_v1 }
  0x89   : > { %278 = vst.msk [vmem:[#allocation3] sm:$0xff] %vm277_vm0, %v1713_v1 }
  0x8a   : > { %279 = vst.msk [vmem:[#allocation3 + $0x8] sm:$0xff] %vm277_vm0, %v1713_v1 }
  0x8b   : > { %280 = vst.msk [vmem:[#allocation3 + $0x10] sm:$0xff] %vm277_vm0, %v1713_v1 }
  0x8c   : > { %281 = vst.msk [vmem:[#allocation3 + $0x18] sm:$0xff] %vm277_vm0, %v1713_v1 }
  0x8d   : > { %282 = vst.msk [vmem:[#allocation3 + $0x20] sm:$0xff] %vm277_vm0, %v1713_v1 }
  0x8e   : > { %283 = vst.msk [vmem:[#allocation3 + $0x28] sm:$0xff] %vm277_vm0, %v1713_v1 }
  0x8f   : > { %284 = vst.msk [vmem:[#allocation3 + $0x30] sm:$0xff] %vm277_vm0, %v1713_v1 }
  0x90   : > { %285 = vst.msk [vmem:[#allocation3 + $0x38] sm:$0xff] %vm277_vm0, %v1713_v1 }
  0x91   : > { %286 = vst.msk [vmem:[#allocation3 + $0x40] sm:$0xff] %vm277_vm0, %v1713_v1 }
  0x92   : > { %287 = vst.msk [vmem:[#allocation3 + $0x48] sm:$0xff] %vm277_vm0, %v1713_v1 }
  0x93   : > { %288 = vst.msk [vmem:[#allocation3 + $0x50] sm:$0xff] %vm277_vm0, %v1713_v1 }
  0x94   : > { %289 = vst.msk [vmem:[#allocation3 + $0x58] sm:$0xff] %vm277_vm0, %v1713_v1 }
  0x95   : > { %290 = vst.msk [vmem:[#allocation3 + $0x60] sm:$0xff] %vm277_vm0, %v1713_v1 }
  0x96   : > { %291 = vst.msk [vmem:[#allocation3 + $0x68] sm:$0xff] %vm277_vm0, %v1713_v1 }
  0x97   : > { %292 = vst.msk [vmem:[#allocation3 + $0x70] sm:$0xff] %vm277_vm0, %v1713_v1 }
  0x98   : > { %293 = vst.msk [vmem:[#allocation3 + $0x78] sm:$0xff] %vm277_vm0, %v1713_v1 }
  0x99 PF: > { %v1261_v2 = vld [vmem:[%s1928_s9 + $0x38] sm:$0xff]  ;;  %v1260_v3 = vld [vmem:[%s1928_s9 + $0x30] sm:$0xff]  ;;  %v295_v4 = vld [vmem:[%s1921_s18 + $0x8] sm:$0xff]  ;;  %vm579_vm1 = vcmask 7168   ;;  %s2495_s6 = sld [smem:[#allocation16_spill]] }
  0x9a   : > { %418 = vmatpush.bf16.msra.mxu0 %v1261_v2  ;;  %1263 = vmatpush.bf16.msra.mxu1 %v1261_v2  ;;  %v302_v5 = vunpack.c.0.s8 %v295_v4  ;;  %v303_v6 = vunpack.c.1.s8 %v295_v4  ;;  %v294_v7 = vld [vmem:[%s1921_s18] sm:$0xff]  ;;  %v1259_v12 = vld [vmem:[%s1928_s9 + $0x28] sm:$0xff]  ;;  %v296_v23 = vld [vmem:[%s1921_s18 + $0x10] sm:$0xff]  ;;  %v304_v26 = vunpack.c.2.s8 %v295_v4  ;;  %v305_v27 = vunpack.c.3.s8 %v295_v4 }
  0x9b   : > { %1264 = vmatpush.bf16.msra.mxu2 %v1261_v2  ;;  %1265 = vmatpush.bf16.msra.mxu3 %v1261_v2  ;;  %v298_v10 = vunpack.c.0.s8 %v294_v7  ;;  %v299_v11 = vunpack.c.1.s8 %v294_v7  ;;  %v300_v16 = vunpack.c.2.s8 %v294_v7  ;;  %v301_v17 = vunpack.c.3.s8 %v294_v7  ;;  %v1258_v21 = vld [vmem:[%s1928_s9 + $0x20] sm:$0xff]  ;;  %v1257_v28 = vld [vmem:[%s1928_s9 + $0x18] sm:$0xff]  ;;  %v1256_v36 = vld [vmem:[%s1928_s9 + $0x10] sm:$0xff] }
  0x9c   : > { %v318_v8 = vcvt.s32.f32 %v302_v5  ;;  %v319_v9 = vcvt.s32.f32 %v303_v6  ;;  %v306_v29 = vunpack.c.0.s8 %v296_v23  ;;  %v307_v30 = vunpack.c.1.s8 %v296_v23  ;;  %v297_v39 = vld [vmem:[%s1921_s18 + $0x18] sm:$0xff]  ;;  %v1255_v43 = vld [vmem:[%s1928_s9 + $0x8] sm:$0xff]  ;;  %v1254_v50 = vld [vmem:[%s1928_s9] sm:$0xff] }
  0x9d   : > { %v314_v14 = vcvt.s32.f32 %v298_v10  ;;  %v315_v15 = vcvt.s32.f32 %v299_v11  ;;  %v316_v20 = vcvt.s32.f32 %v300_v16  ;;  %v317_v22 = vcvt.s32.f32 %v301_v17  ;;  %v503_v6 = vld [vmem:[#allocation3 + $0x20] sm:$0xff]  ;;  %v504_v16 = vld [vmem:[#allocation3 + $0x28] sm:$0xff] }
  0x9e   : > { %419 = vmatpush.bf16.msra.mxu0 %v1260_v3  ;;  %1266 = vmatpush.bf16.msra.mxu1 %v1260_v3  ;;  %v1979_v13 = vpack.c.bf16 %v319_v9, %v318_v8  ;;  %v320_v34 = vcvt.s32.f32 %v304_v26  ;;  %v321_v35 = vcvt.s32.f32 %v305_v27  ;;  %v322_v37 = vcvt.s32.f32 %v306_v29  ;;  %v499_v7 = vld [vmem:[#allocation3] sm:$0xff] }
  0x9f   : > { %1267 = vmatpush.bf16.msra.mxu2 %v1260_v3  ;;  %1268 = vmatpush.bf16.msra.mxu3 %v1260_v3  ;;  %v1981_v18 = vpack.c.bf16 %v315_v15, %v314_v14  ;;  %v1987_v25 = vpack.c.bf16 %v317_v22, %v316_v20  ;;  %v323_v38 = vcvt.s32.f32 %v307_v30  ;;  %v310_v41 = vunpack.c.0.s8 %v297_v39  ;;  %v500_v15 = vld [vmem:[#allocation3 + $0x8] sm:$0xff]  ;;  %v506_v30 = vld [vmem:[#allocation3 + $0x38] sm:$0xff]  ;;  %p1246_p6 = scmp.ne.s32.totalorder %s2495_s6, 1 }
  0xa0   : > { %v519_v19 = vunpack.c.l.bf16 %v1979_v13  ;;  %v520_v32 = vunpack.c.h.bf16 %v1979_v13  ;;  %v333_v42 = vpack.c.bf16 %v321_v35, %v320_v34  ;;  %v311_v45 = vunpack.c.1.s8 %v297_v39  ;;  %v510_v34 = vld [vmem:[#allocation3 + $0x58] sm:$0xff] }
  0xa1   : > { %v515_v24 = vunpack.c.l.bf16 %v1981_v18  ;;  %v517_v31 = vunpack.c.l.bf16 %v1987_v25  ;;  %v516_v33 = vunpack.c.h.bf16 %v1981_v18  ;;  %v518_v40 = vunpack.c.h.bf16 %v1987_v25 }
  0xa2   : > { %420 = vmatpush.bf16.msra.mxu0 %v1259_v12  ;;  %1269 = vmatpush.bf16.msra.mxu1 %v1259_v12  ;;  %v334_v44 = vpack.c.bf16 %v323_v38, %v322_v37  ;;  %v308_v46 = vunpack.c.2.s8 %v296_v23  ;;  %v309_v47 = vunpack.c.3.s8 %v296_v23  ;;  %v521_v49 = vunpack.c.l.bf16 %v333_v42 }
  0xa3   : > { %1270 = vmatpush.bf16.msra.mxu2 %v1259_v12  ;;  %1271 = vmatpush.bf16.msra.mxu3 %v1259_v12  ;;  %v326_v51 = vcvt.s32.f32 %v310_v41  ;;  %v327_v52 = vcvt.s32.f32 %v311_v45  ;;  %v522_v55 = vunpack.c.h.bf16 %v333_v42  ;;  %v312_v58 = vunpack.c.2.s8 %v297_v39  ;;  %v501_v12 = vld [vmem:[#allocation3 + $0x10] sm:$0xff] }
  0xa4   : > { %539 = vadd.xlane.f32.xlu2 %v519_v19  ;;  %531 = vadd.xlane.f32.xlu0 %v515_v24  ;;  %v523_v48 = vunpack.c.l.bf16 %v334_v44  ;;  %v324_v53 = vcvt.s32.f32 %v308_v46  ;;  %v325_v54 = vcvt.s32.f32 %v309_v47  ;;  %v313_v59 = vunpack.c.3.s8 %v297_v39  ;;  %v505_v24 = vld [vmem:[#allocation3 + $0x30] sm:$0xff]  ;;  %v511_v46 = vld [vmem:[#allocation3 + $0x60] sm:$0xff] }
  0xa5   : > { %535 = vadd.xlane.f32.xlu1 %v517_v31  ;;  %v336_v56 = vpack.c.bf16 %v327_v52, %v326_v51  ;;  %v524_v61 = vunpack.c.h.bf16 %v334_v44  ;;  %v328_v62 = vcvt.s32.f32 %v312_v58  ;;  %v509_v39 = vld [vmem:[#allocation3 + $0x50] sm:$0xff]  ;;  %v339_v58 = vld [vmem:[#allocation2] sm:$0xff] }
  0xa6   : > { %421 = vmatpush.bf16.msra.mxu0 %v1258_v21  ;;  %1272 = vmatpush.bf16.msra.mxu1 %v1258_v21  ;;  %v335_v57 = vpack.c.bf16 %v325_v54, %v324_v53  ;;  %v329_v63 = vcvt.s32.f32 %v313_v59  ;;  %v338_v41 = vld [vmem:[#allocation2 + $0x30] sm:$0xff]  ;;  %v512_v54 = vld [vmem:[#allocation3 + $0x68] sm:$0xff] }
  0xa7   : > { %1273 = vmatpush.bf16.msra.mxu2 %v1258_v21  ;;  %1274 = vmatpush.bf16.msra.mxu3 %v1258_v21  ;;  %v527_v3 = vunpack.c.l.bf16 %v336_v56  ;;  %v528_v4 = vunpack.c.h.bf16 %v336_v56  ;;  %v502_v21 = vld [vmem:[#allocation3 + $0x18] sm:$0xff]  ;;  %v513_v47 = vld [vmem:[#allocation3 + $0x70] sm:$0xff]  ;;  %v343_v59 = vld [vmem:[#allocation2 + $0x68] sm:$0xff] }
  0xa8   : > { %v526_v60 = vunpack.c.h.bf16 %v335_v57  ;;  %v525_v0 = vunpack.c.l.bf16 %v335_v57  ;;  %v337_v1 = vpack.c.bf16 %v329_v63, %v328_v62 }
  0xaa   : > { %422 = vmatpush.bf16.msra.mxu0 %v1257_v28  ;;  %1275 = vmatpush.bf16.msra.mxu1 %v1257_v28  ;;  %v529_v2 = vunpack.c.l.bf16 %v337_v1  ;;  %v530_v5 = vunpack.c.h.bf16 %v337_v1 }
  0xab   : > { %1276 = vmatpush.bf16.msra.mxu2 %v1257_v28  ;;  %1277 = vmatpush.bf16.msra.mxu3 %v1257_v28 }
  0xac   : > { %541 = vadd.xlane.f32.xlu2 %v520_v32  ;;  %533 = vadd.xlane.f32.xlu0 %v516_v33  ;;  %v508_v33 = vld [vmem:[#allocation3 + $0x48] sm:$0xff] }
  0xad   : > { %537 = vadd.xlane.f32.xlu1 %v518_v40 }
  0xae   : > { %423 = vmatpush.bf16.msra.mxu0 %v1256_v36  ;;  %1278 = vmatpush.bf16.msra.mxu1 %v1256_v36 }
  0xaf   : > { %1279 = vmatpush.bf16.msra.mxu2 %v1256_v36  ;;  %1280 = vmatpush.bf16.msra.mxu3 %v1256_v36 }
  0xb2   : > { %424 = vmatpush.bf16.msra.mxu0 %v1255_v43  ;;  %1281 = vmatpush.bf16.msra.mxu1 %v1255_v43 }
  0xb3   : > { %1282 = vmatpush.bf16.msra.mxu2 %v1255_v43  ;;  %1283 = vmatpush.bf16.msra.mxu3 %v1255_v43 }
  0xb4   : > { %547 = vadd.xlane.f32.xlu2 %v523_v48  ;;  %543 = vadd.xlane.f32.xlu0 %v521_v49 }
  0xb5   : > { %545 = vadd.xlane.f32.xlu1 %v522_v55  ;;  %v346_v55 = vld [vmem:[#allocation2 + $0x40] sm:$0xff] }
  0xb6   : > { %425 = vmatpush.bf16.msra.mxu0 %v1254_v50  ;;  %1284 = vmatpush.bf16.msra.mxu1 %v1254_v50 }
  0xb7   : > { %1285 = vmatpush.bf16.msra.mxu2 %v1254_v50  ;;  %1286 = vmatpush.bf16.msra.mxu3 %v1254_v50 }
  0xb9   : > { %436 = vmatmul.bf16.vlgmr.msra.gmra.mxu1 %v1979_v13  ;;  %426 = vmatmul.bf16.vlgmr.msra.gmra.mxu0 %v1981_v18 }
  0xba   : > { %446 = vmatmul.bf16.vlgmr.msra.gmra.mxu2 %v334_v44  ;;  %456 = vmatmul.bf16.vlgmr.msra.gmra.mxu3 %v336_v56  ;;  %v350_v56 = vld [vmem:[#allocation2 + $0x60] sm:$0xff] }
  0xbc   : > { %553 = vadd.xlane.f32.xlu2 %v526_v60  ;;  %549 = vadd.xlane.f32.xlu0 %v524_v61 }
  0xbd   : > { %551 = vadd.xlane.f32.xlu1 %v525_v0 }
  0xc4   : > { %559 = vadd.xlane.f32.xlu2 %v529_v2  ;;  %555 = vadd.xlane.f32.xlu0 %v527_v3  ;;  %v514_v3 = vld [vmem:[#allocation3 + $0x78] sm:$0xff] }
  0xc5   : > { %557 = vadd.xlane.f32.xlu1 %v528_v4 }
  0xc9   : > { %441 = vmatmul.bf16.gmra.mxu1 %v333_v42  ;;  %431 = vmatmul.bf16.gmra.mxu0 %v1987_v25  ;;  %v507_v25 = vld [vmem:[#allocation3 + $0x40] sm:$0xff]  ;;  %v342_v42 = vld [vmem:[#allocation2 + $0x50] sm:$0xff] }
  0xca   : > { %451 = vmatmul.bf16.gmra.mxu2 %v335_v57  ;;  %461 = vmatmul.bf16.gmra.mxu3 %v337_v1 }
  0xcc   : > { %561 = vadd.xlane.f32.xlu0 %v530_v5 }
 0x117   : > { %v540_v8 = vpop.xlane.xlu2 %539  ;;  %v532_v9 = vpop.xlane.xlu0 %531 }
 0x118   : > { %v567_v10 = vadd.f32 %v540_v8, %v503_v6  ;;  %v563_v11 = vadd.f32 %v532_v9, %v499_v7  ;;  %v536_v13 = vpop.xlane.xlu1 %535  ;;  %v347_v8 = vld [vmem:[#allocation2 + $0x20] sm:$0xff]  ;;  %v351_v9 = vld [vmem:[#allocation2 + $0x70] sm:$0xff] }
 0x119   : > { %v565_v14 = vadd.f32 %v536_v13, %v501_v12 }
 0x11a   : > { %584 = vst.msk [vmem:[#allocation3 + $0x20] sm:$0xff] %vm579_vm1, %v567_v10  ;;  %v340_v10 = vld [vmem:[#allocation2 + $0x58] sm:$0xff] }
 0x11b   : > { %580 = vst.msk [vmem:[#allocation3] sm:$0xff] %vm579_vm1, %v563_v11  ;;  %v344_v11 = vld [vmem:[#allocation2 + $0x8] sm:$0xff] }
 0x11c   : > { %582 = vst.msk [vmem:[#allocation3 + $0x10] sm:$0xff] %vm579_vm1, %v565_v14 }
 0x11f   : > { %v542_v17 = vpop.xlane.xlu2 %541  ;;  %v534_v18 = vpop.xlane.xlu0 %533 }
 0x120   : > { %v568_v19 = vadd.f32 %v542_v17, %v504_v16  ;;  %v564_v20 = vadd.f32 %v534_v18, %v500_v15  ;;  %v538_v22 = vpop.xlane.xlu1 %537 }
 0x121   : > { %v566_v23 = vadd.f32 %v538_v22, %v502_v21  ;;  %v352_v21 = vld [vmem:[#allocation2 + $0x78] sm:$0xff] }
 0x122   : > { %585 = vst.msk [vmem:[#allocation3 + $0x28] sm:$0xff] %vm579_vm1, %v568_v19  ;;  %v341_v22 = vld [vmem:[#allocation2 + $0x18] sm:$0xff] }
 0x123   : > { %581 = vst.msk [vmem:[#allocation3 + $0x8] sm:$0xff] %vm579_vm1, %v564_v20  ;;  %v348_v20 = vld [vmem:[#allocation2 + $0x10] sm:$0xff] }
 0x124   : > { %583 = vst.msk [vmem:[#allocation3 + $0x18] sm:$0xff] %vm579_vm1, %v566_v23  ;;  %v345_v23 = vld [vmem:[#allocation2 + $0x48] sm:$0xff] }
 0x127   : > { %v548_v26 = vpop.xlane.xlu2 %547  ;;  %v544_v27 = vpop.xlane.xlu0 %543 }
 0x128   : > { %v571_v28 = vadd.f32 %v548_v26, %v507_v25  ;;  %v569_v29 = vadd.f32 %v544_v27, %v505_v24  ;;  %v546_v31 = vpop.xlane.xlu1 %545 }
 0x129   : > { %v570_v32 = vadd.f32 %v546_v31, %v506_v30 }
 0x12a   : > { %588 = vst.msk [vmem:[#allocation3 + $0x40] sm:$0xff] %vm579_vm1, %v571_v28 }
 0x12b   : > { %586 = vst.msk [vmem:[#allocation3 + $0x30] sm:$0xff] %vm579_vm1, %v569_v29 }
 0x12c   : > { %587 = vst.msk [vmem:[#allocation3 + $0x38] sm:$0xff] %vm579_vm1, %v570_v32  ;;  %v349_v32 = vld [vmem:[#allocation2 + $0x38] sm:$0xff] }
 0x12f   : > { %v554_v35 = vpop.xlane.xlu2 %553  ;;  %v550_v36 = vpop.xlane.xlu0 %549 }
 0x130   : > { %v574_v37 = vadd.f32 %v554_v35, %v510_v34  ;;  %v572_v38 = vadd.f32 %v550_v36, %v508_v33  ;;  %v552_v40 = vpop.xlane.xlu1 %551  ;;  %v353_v33 = vld [vmem:[#allocation2 + $0x28] sm:$0xff] }
 0x131   : > { %v573_v43 = vadd.f32 %v552_v40, %v509_v39 }
 0x132   : > { %591 = vst.msk [vmem:[#allocation3 + $0x58] sm:$0xff] %vm579_vm1, %v574_v37 }
 0x133   : > { %589 = vst.msk [vmem:[#allocation3 + $0x48] sm:$0xff] %vm579_vm1, %v572_v38 }
 0x134   : > { %590 = vst.msk [vmem:[#allocation3 + $0x50] sm:$0xff] %vm579_vm1, %v573_v43 }
 0x136   : > { %v427_v44 = vpop.f32.mrf.mxu0  ;;  %v437_v45 = vpop.f32.mrf.mxu1 }
 0x137   : > { %v467_v48 = vadd.f32 %v427_v44, %v338_v41  ;;  %v471_v49 = vadd.f32 %v437_v45, %v342_v42  ;;  %v560_v50 = vpop.xlane.xlu2 %559  ;;  %v556_v51 = vpop.xlane.xlu0 %555 }
 0x138   : > { %v577_v52 = vadd.f32 %v560_v50, %v513_v47  ;;  %v575_v53 = vadd.f32 %v556_v51, %v511_v46  ;;  %v558_v57 = vpop.xlane.xlu1 %557 }
 0x139   : > { %483 = vst [vmem:[#allocation2 + $0x30] sm:$0xff] %v467_v48  ;;  %v576_v60 = vadd.f32 %v558_v57, %v512_v54 }
 0x13a   : > { %487 = vst [vmem:[#allocation2 + $0x50] sm:$0xff] %v471_v49 }
 0x13b   : > { %592 = vst.msk [vmem:[#allocation3 + $0x60] sm:$0xff] %vm579_vm1, %v575_v53 }
 0x13c   : > { %594 = vst.msk [vmem:[#allocation3 + $0x70] sm:$0xff] %vm579_vm1, %v577_v52 }
 0x13d   : > { %v447_v61 = vpop.f32.mrf.mxu2  ;;  %v457_v62 = vpop.f32.mrf.mxu3  ;;  %593 = vst.msk [vmem:[#allocation3 + $0x68] sm:$0xff] %vm579_vm1, %v576_v60 }
 0x13e   : > { %v475_v63 = vadd.f32 %v447_v61, %v346_v55  ;;  %v479_v0 = vadd.f32 %v457_v62, %v350_v56  ;;  %v429_v1 = vpop.f32.mrf.mxu0  ;;  %v439_v2 = vpop.f32.mrf.mxu1 }
 0x13f   : > { %v468_v4 = vadd.f32 %v429_v1, %v339_v58  ;;  %v472_v5 = vadd.f32 %v439_v2, %v343_v59  ;;  %v562_v6 = vpop.xlane.xlu0 %561 }
 0x140   : > { %491 = vst [vmem:[#allocation2 + $0x40] sm:$0xff] %v475_v63  ;;  %v578_v7 = vadd.f32 %v562_v6, %v514_v3 }
 0x141   : > { %495 = vst [vmem:[#allocation2 + $0x60] sm:$0xff] %v479_v0 }
 0x142   : > { %484 = vst [vmem:[#allocation2] sm:$0xff] %v468_v4 }
 0x143   : > { %488 = vst [vmem:[#allocation2 + $0x68] sm:$0xff] %v472_v5 }
 0x144   : > { %595 = vst.msk [vmem:[#allocation3 + $0x78] sm:$0xff] %vm579_vm1, %v578_v7 }
 0x145   : > { %v449_v12 = vpop.f32.mrf.mxu2  ;;  %v459_v13 = vpop.f32.mrf.mxu3 }
 0x146   : > { %v476_v14 = vadd.f32 %v449_v12, %v347_v8  ;;  %v480_v15 = vadd.f32 %v459_v13, %v351_v9  ;;  %v432_v16 = vpop.f32.mrf.mxu0  ;;  %v442_v17 = vpop.f32.mrf.mxu1 }
 0x147   : > { %v469_v18 = vadd.f32 %v432_v16, %v340_v10  ;;  %v473_v19 = vadd.f32 %v442_v17, %v344_v11 }
 0x148   : > { %492 = vst [vmem:[#allocation2 + $0x20] sm:$0xff] %v476_v14 }
 0x149   : > { %496 = vst [vmem:[#allocation2 + $0x70] sm:$0xff] %v480_v15 }
 0x14a   : > { %485 = vst [vmem:[#allocation2 + $0x58] sm:$0xff] %v469_v18 }
 0x14b   : > { %489 = vst [vmem:[#allocation2 + $0x8] sm:$0xff] %v473_v19 }
 0x14d   : > { %v452_v24 = vpop.f32.mrf.mxu2  ;;  %v462_v25 = vpop.f32.mrf.mxu3 }
 0x14e   : > { %v477_v26 = vadd.f32 %v452_v24, %v348_v20  ;;  %v481_v27 = vadd.f32 %v462_v25, %v352_v21  ;;  %v434_v28 = vpop.f32.mrf.mxu0  ;;  %v444_v29 = vpop.f32.mrf.mxu1 }
 0x14f   : > { %v470_v30 = vadd.f32 %v434_v28, %v341_v22  ;;  %v474_v31 = vadd.f32 %v444_v29, %v345_v23 }
 0x150   : > { %493 = vst [vmem:[#allocation2 + $0x10] sm:$0xff] %v477_v26 }
 0x151   : > { %497 = vst [vmem:[#allocation2 + $0x78] sm:$0xff] %v481_v27 }
 0x152   : > { %486 = vst [vmem:[#allocation2 + $0x18] sm:$0xff] %v470_v30 }
 0x153   : > { %490 = vst [vmem:[#allocation2 + $0x48] sm:$0xff] %v474_v31 }
 0x155   : > { %v454_v34 = vpop.f32.mrf.mxu2  ;;  %v464_v35 = vpop.f32.mrf.mxu3  ;;  %599 = sbr.rel (%p1246_p6) target bundleno = 542 (0x21e), region = 48 }
 0x156   : > { %v478_v36 = vadd.f32 %v454_v34, %v349_v32  ;;  %v482_v37 = vadd.f32 %v464_v35, %v353_v33 }
 0x158   : > { %494 = vst [vmem:[#allocation2 + $0x38] sm:$0xff] %v478_v36 }
 0x159   : > { %498 = vst [vmem:[#allocation2 + $0x28] sm:$0xff] %v482_v37 }
 0x15a   : > { %v2018_v38 = vld [vmem:[#allocation3 + $0x20] sm:$0xff]  ;;  %v2020_v39 = vld [vmem:[#allocation3 + $0x10] sm:$0xff]  ;;  %v1714_v41 = vmov 0   ;;  %v2028_v44 = vld [vmem:[#allocation3 + $0x28] sm:$0xff] }
 0x15b   : > { %v2022_v40 = vld [vmem:[#allocation3] sm:$0xff]  ;;  %1446 = vset.pattern.permute.xlu2 %v1714_v41  ;;  %1445 = vset.pattern.permute.xlu1 %v1714_v41  ;;  %v636_v42 = vmax.f32 %v2018_v38, 1.0  ;;  %v2026_v43 = vmax.f32 %v2020_v39, 1.0  ;;  %v2034_v46 = vmax.f32 %v2028_v44, 1.0  ;;  %v2040_v51 = vld [vmem:[#allocation3 + $0x18] sm:$0xff]  ;;  %v2043_v53 = vld [vmem:[#allocation3 + $0x8] sm:$0xff] }
 0x15c   : > { %1444 = vset.pattern.permute.xlu0 %v1714_v41  ;;  %v2031_v45 = vmax.f32 %v2022_v40, 1.0  ;;  %v2055_v59 = vmax.f32 %v2040_v51, 1.0  ;;  %v2064_v63 = vmax.f32 %v2043_v53, 1.0  ;;  %v2085_v17 = vld [vmem:[#allocation3 + $0x40] sm:$0xff]  ;;  %vm621_vm11 = vcmp.gt.f32.partialorder %v2028_v44, 0.0 }
 0x15d   : > { %1447 = vrcp.f32 %v636_v42  ;;  %v717_v47 = vand.u32 2147483647, %v636_v42  ;;  %v719_v48 = vand.u32 2147483648, %v636_v42  ;;  %v687_v49 = vand.u32 2147483647, %v2026_v43 }
 0x15e   : > { %1449 = vrcp.f32 %v2026_v43  ;;  %v689_v50 = vand.u32 2147483648, %v2026_v43  ;;  %vm713_vm2 = vweird.f32 %v636_v42  ;;  %v657_v52 = vand.u32 2147483647, %v2031_v45 }
 0x15f   : > { %1451 = vrcp.f32 %v2031_v45  ;;  %vm683_vm3 = vweird.f32 %v2026_v43  ;;  %v659_v54 = vand.u32 2147483648, %v2031_v45  ;;  %v734_v55 = vand.u32 2147483648, %v2034_v46 }
 0x160   : > { %1453 = vrcp.f32 %v2034_v46  ;;  %vm2049_vm4 = vcmp.eq.f32.partialorder %v717_v47, 8.507059e+37  ;;  %v720_v57 = vor.u32 1.1754944e-38, %v719_v48  ;;  %v732_v58 = vand.u32 2147483647, %v2034_v46 }
 0x161   : > { %vm2058_vm6 = vcmp.eq.f32.partialorder %v687_v49, 8.507059e+37  ;;  %v690_v62 = vor.u32 1.1754944e-38, %v689_v50  ;;  %vm653_vm7 = vweird.f32 %v2031_v45  ;;  %vm2067_vm9 = vcmp.eq.f32.partialorder %v657_v52, 8.507059e+37 }
 0x162   : > { %vm728_vm10 = vweird.f32 %v2034_v46  ;;  %1455 = vrcp.f32 %v2055_v59  ;;  %v660_v5 = vor.u32 1.1754944e-38, %v659_v54  ;;  %v735_v6 = vor.u32 1.1754944e-38, %v734_v55 }
 0x163   : > { %v1448_v60 = vpop.eup %1447  ;;  %v704_v7 = vand.u32 2147483648, %v2055_v59  ;;  %vm2077_vm13 = vcmp.eq.f32.partialorder %v732_v58, 8.507059e+37  ;;  %1457 = vrcp.f32 %v2064_v63  ;;  %v702_v13 = vand.u32 2147483647, %v2055_v59 }
 0x164   : > { %v1450_v0 = vpop.eup %1449  ;;  %v709_v1 = vmul.f32 %v1448_v60, %v636_v42  ;;  %vm714_vm12 = vweird.f32 %v1448_v60  ;;  %vm668_vm15 = vweird.f32 %v2064_v63  ;;  %v672_v26 = vand.u32 2147483647, %v2064_v63 }
 0x165   : > { %v1452_v3 = vpop.eup %1451  ;;  %v679_v4 = vmul.f32 %v1450_v0, %v2026_v43  ;;  %vm684_vm14 = vweird.f32 %v1450_v0  ;;  %vm2088_vm1 = vmor %vm713_vm2, %vm714_vm12  ;;  %v705_v20 = vor.u32 1.1754944e-38, %v704_v7  ;;  %v674_v30 = vand.u32 2147483648, %v2064_v63 }
 0x166   : > { %v710_v8 = vsub.f32 1.0, %v709_v1  ;;  %v649_v9 = vmul.f32 %v1452_v3, %v2031_v45  ;;  %v1454_v11 = vpop.eup %1453  ;;  %vm654_vm0 = vweird.f32 %v1452_v3  ;;  %vm2097_vm5 = vmor %vm683_vm3, %vm684_vm14  ;;  %v2112_v31 = vmax.f32 %v2085_v17, 1.0 }
 0x167   : > { %v680_v12 = vsub.f32 1.0, %v679_v4  ;;  %v724_v16 = vmul.f32 %v1454_v11, %v2034_v46  ;;  %vm729_vm8 = vweird.f32 %v1454_v11  ;;  %vm2105_vm2 = vmor %vm653_vm7, %vm654_vm0  ;;  %vm2512_vm12 = vcmp.gt.f32.partialorder %v2018_v38, 0.0 }
 0x168   : > { %v711_v14 = vmul.f32 %v1448_v60, %v710_v8  ;;  %v650_v15 = vsub.f32 1.0, %v649_v9  ;;  %v1456_v21 = vpop.eup %1455  ;;  %vm2123_vm7 = vmor %vm728_vm10, %vm729_vm8  ;;  %1459 = vrcp.f32 %v2112_v31  ;;  %vm619_vm14 = vcmp.gt.f32.partialorder %v2040_v51, 0.0  ;;  %v2174_v9 = vld [vmem:[#allocation3 + $0x50] sm:$0xff] }
 0x169   : > { %v681_v19 = vmul.f32 %v1450_v0, %v680_v12  ;;  %v725_v25 = vsub.f32 1.0, %v724_v16  ;;  %v694_v29 = vmul.f32 %v1456_v21, %v2055_v59  ;;  %v1458_v32 = vpop.eup %1457  ;;  %vm699_vm3 = vweird.f32 %v1456_v21 }
 0x16a   : > { %v712_v22 = vadd.f32 %v1448_v60, %v711_v14  ;;  %v651_v24 = vmul.f32 %v1452_v3, %v650_v15  ;;  %v664_v43 = vmul.f32 %v1458_v32, %v2064_v63  ;;  %vm669_vm10 = vweird.f32 %v1458_v32 }
 0x16b   : > { %v682_v27 = vadd.f32 %v1450_v0, %v681_v19  ;;  %v726_v35 = vmul.f32 %v1454_v11, %v725_v25  ;;  %v695_v42 = vsub.f32 1.0, %v694_v29  ;;  %vm670_vm0 = vmor %vm668_vm15, %vm669_vm10  ;;  %v777_v8 = vand.u32 2147483647, %v2112_v31  ;;  %v2200_v25 = vld [vmem:[#allocation3 + $0x48] sm:$0xff] }
 0x16c   : > { %v716_v33 = vsel %vm2088_vm1, %v1448_v60, %v712_v22  ;;  %v652_v34 = vadd.f32 %v1452_v3, %v651_v24  ;;  %v665_v54 = vsub.f32 1.0, %v664_v43  ;;  %v2154_v60 = vld [vmem:[#allocation3 + $0x30] sm:$0xff]  ;;  %vm673_vm1 = vcmp.eq.f32.partialorder %v672_v26, 8.507059e+37  ;;  %v931_v43 = vld [vmem:[#allocation2 + $0x38] sm:$0xff] }
 0x16d   : > { %v721_v36 = vsel %vm2049_vm4, %v720_v57, %v716_v33  ;;  %v686_v37 = vsel %vm2097_vm5, %v1450_v0, %v682_v27  ;;  %v727_v49 = vadd.f32 %v1454_v11, %v726_v35  ;;  %vm2513_vm4 = vcmp.gt.f32.partialorder %v2020_v39, 0.0  ;;  %v2150_v39 = vld [vmem:[#allocation3 + $0x38] sm:$0xff] }
 0x16e   : > { %v892_v45 = vsel %vm2512_vm12, %v721_v36, 0.0  ;;  %v691_v47 = vsel %vm2058_vm6, %v690_v62, %v686_v37  ;;  %v656_v48 = vsel %vm2105_vm2, %v1452_v3, %v652_v34  ;;  %v696_v52 = vmul.f32 %v1456_v21, %v695_v42  ;;  %v1460_v4 = vpop.eup %1459 }
 0x16f   : > { %958 = vperm.xlu2 %1446, %v892_v45   ;;  %v890_v46 = vsel %vm2513_vm4, %v691_v47, 0.0  ;;  %v661_v50 = vsel %vm2067_vm9, %v660_v5, %v656_v48  ;;  %vm2514_vm5 = vcmp.gt.f32.partialorder %v2022_v40, 0.0  ;;  %v731_v55 = vsel %vm2123_vm7, %v1454_v11, %v727_v49  ;;  %v2230_v48 = vld [vmem:[#allocation3 + $0x70] sm:$0xff] }
 0x170   : > { %948 = vperm.xlu1 %1445, %v890_v46   ;;  %v888_v38 = vsel %vm2514_vm5, %v661_v50, 0.0  ;;  %vm2515_vm6 = vweird.f32 %v2055_v59  ;;  %v736_v40 = vsel %vm2077_vm13, %v735_v6, %v731_v55  ;;  %v697_v57 = vadd.f32 %v1456_v21, %v696_v52  ;;  %v2169_v6 = vld [vmem:[#allocation3 + $0x58] sm:$0xff] }
 0x171   : > { %vm2145_vm8 = vmor %vm2515_vm6, %vm699_vm3  ;;  %938 = vperm.xlu0 %1444, %v888_v38   ;;  %vm703_vm9 = vcmp.eq.f32.partialorder %v702_v13, 8.507059e+37  ;;  %v666_v58 = vmul.f32 %v1458_v32, %v665_v54  ;;  %v675_v59 = vor.u32 1.1754944e-38, %v674_v30  ;;  %v639_v0 = vmax.f32 %v2150_v39, 1.0 }
 0x172   : > { %v701_v61 = vsel %vm2145_vm8, %v1456_v21, %v697_v57  ;;  %v893_v1 = vsel %vm621_vm11, %v736_v40, 0.0  ;;  %vm617_vm13 = vcmp.gt.f32.partialorder %v2043_v53, 0.0  ;;  %v2166_v3 = vmax.f32 %v2154_v60, 1.0 }
 0x173   : > { %v667_v62 = vadd.f32 %v1458_v32, %v666_v58  ;;  %v706_v2 = vsel %vm703_vm9, %v705_v20, %v701_v61  ;;  %1461 = vrcp.f32 %v639_v0  ;;  %v769_v44 = vmul.f32 %v1460_v4, %v2112_v31 }
 0x174   : > { %v891_v51 = vsel %vm619_vm14, %v706_v2, 0.0  ;;  %1463 = vrcp.f32 %v2166_v3  ;;  %v779_v53 = vand.u32 2147483648, %v2112_v31  ;;  %vm773_vm11 = vweird.f32 %v2112_v31 }
 0x175   : > { %v671_v63 = vsel %vm670_vm0, %v1458_v32, %v667_v62  ;;  %v770_v10 = vsub.f32 1.0, %v769_v44  ;;  %vm774_vm15 = vweird.f32 %v1460_v4  ;;  %v762_v11 = vand.u32 2147483647, %v639_v0 }
 0x176   : > { %v676_v5 = vsel %vm673_vm1, %v675_v59, %v671_v63  ;;  %v2178_v12 = vmax.f32 %v2169_v6, 1.0  ;;  %vm624_vm2 = vcmp.gt.f32.partialorder %v2085_v17, 0.0  ;;  %v764_v13 = vand.u32 2147483648, %v639_v0  ;;  %vm2193_vm12 = vmor %vm773_vm11, %vm774_vm15 }
 0x177   : > { %963 = vperm.xlu2 %1446, %v893_v1   ;;  %v889_v7 = vsel %vm617_vm13, %v676_v5, 0.0  ;;  %v747_v14 = vand.u32 2147483647, %v2166_v3  ;;  %v2183_v15 = vmax.f32 %v2174_v9, 1.0  ;;  %v771_v18 = vmul.f32 %v1460_v4, %v770_v10 }
 0x178   : > { %953 = vperm.xlu1 %1445, %v891_v51   ;;  %vm2185_vm3 = vcmp.eq.f32.partialorder %v777_v8, 8.507059e+37  ;;  %v780_v20 = vor.u32 1.1754944e-38, %v779_v53  ;;  %vm623_vm7 = vcmp.gt.f32.partialorder %v2150_v39, 0.0  ;;  %1465 = vrcp.f32 %v2178_v12  ;;  %v2263_v51 = vld [vmem:[#allocation3 + $0x68] sm:$0xff] }
 0x179   : > { %943 = vperm.xlu0 %1444, %v889_v7   ;;  %v1462_v16 = vpop.eup %1461  ;;  %vm758_vm4 = vweird.f32 %v639_v0  ;;  %vm622_vm5 = vcmp.gt.f32.partialorder %v2154_v60, 0.0  ;;  %v749_v24 = vand.u32 2147483648, %v2166_v3  ;;  %1467 = vrcp.f32 %v2183_v15 }
 0x17a   : > { %v1464_v21 = vpop.eup %1463  ;;  %v754_v23 = vmul.f32 %v1462_v16, %v639_v0  ;;  %v772_v26 = vadd.f32 %v1460_v4, %v771_v18  ;;  %vm2202_vm6 = vcmp.eq.f32.partialorder %v762_v11, 8.507059e+37  ;;  %vm743_vm8 = vweird.f32 %v2166_v3  ;;  %v2292_v18 = vld [vmem:[#allocation3 + $0x60] sm:$0xff] }
 0x17b   : > { %v739_v28 = vmul.f32 %v1464_v21, %v2166_v3  ;;  %vm759_vm10 = vweird.f32 %v1462_v16  ;;  %v765_v30 = vor.u32 1.1754944e-38, %v764_v13  ;;  %vm2208_vm9 = vcmp.eq.f32.partialorder %v747_v14, 8.507059e+37 }
 0x17c   : > { %v755_v29 = vsub.f32 1.0, %v754_v23  ;;  %v776_v32 = vsel %vm2193_vm12, %v1460_v4, %v772_v26  ;;  %vm744_vm14 = vweird.f32 %v1464_v21  ;;  %v2215_v34 = vmax.f32 %v2200_v25, 1.0  ;;  %vm2223_vm1 = vmor %vm758_vm4, %vm759_vm10 }
 0x17d   : > { %v740_v33 = vsub.f32 1.0, %v739_v28  ;;  %v781_v35 = vsel %vm2185_vm3, %v780_v20, %v776_v32  ;;  %v750_v37 = vor.u32 1.1754944e-38, %v749_v24  ;;  %vm818_vm0 = vweird.f32 %v2178_v12  ;;  %vm2235_vm11 = vmor %vm743_vm8, %vm744_vm14  ;;  %v2313_v32 = vld [vmem:[#allocation3 + $0x78] sm:$0xff] }
 0x17e   : > { %v756_v36 = vmul.f32 %v1462_v16, %v755_v29  ;;  %v1466_v41 = vpop.eup %1465  ;;  %v896_v42 = vsel %vm624_vm2, %v781_v35, 0.0  ;;  %vm627_vm13 = vcmp.gt.f32.partialorder %v2169_v6, 0.0  ;;  %v822_v47 = vand.u32 2147483647, %v2178_v12 }
 0x17f   : > { %v741_v45 = vmul.f32 %v1464_v21, %v740_v33  ;;  %1469 = vrcp.f32 %v2215_v34  ;;  %v1468_v49 = vpop.eup %1467  ;;  %978 = vperm.xlu2 %1446, %v896_v42   ;;  %v814_v50 = vmul.f32 %v1466_v41, %v2178_v12  ;;  %v824_v52 = vand.u32 2147483648, %v2178_v12 }
 0x180   : > { %v757_v46 = vadd.f32 %v1462_v16, %v756_v36  ;;  %vm626_vm15 = vcmp.gt.f32.partialorder %v2174_v9, 0.0  ;;  %vm803_vm2 = vweird.f32 %v2183_v15  ;;  %v799_v38 = vmul.f32 %v1468_v49, %v2183_v15 }
 0x181   : > { %v742_v54 = vadd.f32 %v1464_v21, %v741_v45  ;;  %v807_v55 = vand.u32 2147483647, %v2183_v15  ;;  %v809_v56 = vand.u32 2147483648, %v2183_v15  ;;  %v815_v57 = vsub.f32 1.0, %v814_v50 }
 0x182   : > { %v761_v40 = vsel %vm2223_vm1, %v1462_v16, %v757_v46  ;;  %vm819_vm3 = vweird.f32 %v1466_v41  ;;  %v2249_v58 = vmax.f32 %v2230_v48, 1.0  ;;  %v800_v62 = vsub.f32 1.0, %v799_v38 }
 0x183   : > { %v766_v59 = vsel %vm2202_vm6, %v765_v30, %v761_v40  ;;  %v746_v61 = vsel %vm2235_vm11, %v1464_v21, %v742_v54  ;;  %vm804_vm12 = vweird.f32 %v1468_v49  ;;  %v816_v2 = vmul.f32 %v1466_v41, %v815_v57  ;;  %vm2269_vm6 = vmor %vm818_vm0, %vm819_vm3 }
 0x184   : > { %v895_v0 = vsel %vm623_vm7, %v766_v59, 0.0  ;;  %v751_v1 = vsel %vm2208_vm9, %v750_v37, %v746_v61  ;;  %vm2259_vm4 = vcmp.eq.f32.partialorder %v822_v47, 8.507059e+37  ;;  %v825_v5 = vor.u32 1.1754944e-38, %v824_v52  ;;  %vm2277_vm7 = vmor %vm803_vm2, %vm804_vm12 }
 0x185   : > { %v1470_v63 = vpop.eup %1469  ;;  %973 = vperm.xlu1 %1445, %v895_v0   ;;  %v894_v4 = vsel %vm622_vm5, %v751_v1, 0.0  ;;  %v801_v7 = vmul.f32 %v1468_v49, %v800_v62  ;;  %1471 = vrcp.f32 %v2249_v58  ;;  %v817_v44 = vadd.f32 %v1466_v41, %v816_v2 }
 0x186   : > { %968 = vperm.xlu0 %1444, %v894_v4   ;;  %vm2281_vm5 = vcmp.eq.f32.partialorder %v807_v55, 8.507059e+37  ;;  %v810_v53 = vor.u32 1.1754944e-38, %v809_v56  ;;  %v784_v10 = vmul.f32 %v1470_v63, %v2215_v34  ;;  %vm788_vm8 = vweird.f32 %v2215_v34 }
 0x187   : > { %v802_v11 = vadd.f32 %v1468_v49, %v801_v7  ;;  %v794_v12 = vand.u32 2147483648, %v2215_v34  ;;  %v645_v13 = vmax.f32 %v2263_v51, 1.0  ;;  %v821_v14 = vsel %vm2269_vm6, %v1466_v41, %v817_v44 }
 0x188   : > { %v785_v15 = vsub.f32 1.0, %v784_v10  ;;  %vm789_vm10 = vweird.f32 %v1470_v63  ;;  %v792_v16 = vand.u32 2147483647, %v2215_v34  ;;  %v826_v19 = vsel %vm2259_vm4, %v825_v5, %v821_v14 }
 0x189   : > { %v806_v20 = vsel %vm2277_vm7, %v1468_v49, %v802_v11  ;;  %1473 = vrcp.f32 %v645_v13  ;;  %v899_v21 = vsel %vm627_vm13, %v826_v19, 0.0  ;;  %vm2306_vm9 = vmor %vm788_vm8, %vm789_vm10  ;;  %v795_v28 = vor.u32 1.1754944e-38, %v794_v12  ;;  %v908_v19 = vld [vmem:[%s1939_s3 + $0x20] sm:$0xff] }
 0x18a   : > { %v811_v22 = vsel %vm2281_vm5, %v810_v53, %v806_v20  ;;  %v786_v23 = vmul.f32 %v1470_v63, %v785_v15  ;;  %993 = vperm.xlu2 %1446, %v899_v21   ;;  %v644_v29 = vmax.f32 %v2292_v18, 1.0  ;;  %vm793_vm14 = vcmp.eq.f32.partialorder %v792_v16, 8.507059e+37 }
 0x18b   : > { %v1472_v24 = vpop.eup %1471  ;;  %v898_v26 = vsel %vm626_vm15, %v811_v22, 0.0  ;;  %v867_v31 = vand.u32 2147483647, %v2249_v58  ;;  %vm625_vm0 = vcmp.gt.f32.partialorder %v2200_v25, 0.0  ;;  %v869_v9 = vand.u32 2147483648, %v2249_v58 }
 0x18c   : > { %v787_v6 = vadd.f32 %v1470_v63, %v786_v23  ;;  %v859_v30 = vmul.f32 %v1472_v24, %v2249_v58  ;;  %1475 = vrcp.f32 %v644_v29  ;;  %vm863_vm1 = vweird.f32 %v2249_v58  ;;  %v925_v23 = vld [vmem:[#allocation2 + $0x68] sm:$0xff] }
 0x18d   : > { %988 = vperm.xlu1 %1445, %v898_v26   ;;  %vm864_vm13 = vweird.f32 %v1472_v24  ;;  %v647_v37 = vmax.f32 %v2313_v32, 1.0  ;;  %vm2321_vm11 = vcmp.eq.f32.partialorder %v867_v31, 8.507059e+37  ;;  %v870_v47 = vor.u32 1.1754944e-38, %v869_v9  ;;  %v922_v9 = vld [vmem:[#allocation2 + $0x58] sm:$0xff] }
 0x18e   : > { %v791_v33 = vsel %vm2306_vm9, %v1470_v63, %v787_v6  ;;  %v860_v34 = vsub.f32 1.0, %v859_v30  ;;  %vm2325_vm15 = vmor %vm863_vm1, %vm864_vm13  ;;  %v852_v49 = vand.u32 2147483647, %v645_v13  ;;  %v854_v46 = vand.u32 2147483648, %v645_v13  ;;  %v912_v6 = vld [vmem:[%s1939_s3 + $0x40] sm:$0xff] }
 0x18f   : > { %v1474_v35 = vpop.eup %1473  ;;  %v796_v36 = vsel %vm793_vm14, %v795_v28, %v791_v33  ;;  %1477 = vrcp.f32 %v647_v37  ;;  %vm848_vm2 = vweird.f32 %v645_v13  ;;  %vm630_vm12 = vcmp.gt.f32.partialorder %v2230_v48, 0.0  ;;  %v920_v33 = vld [vmem:[#allocation2 + $0x30] sm:$0xff] }
 0x190   : > { %v897_v41 = vsel %vm625_vm0, %v796_v36, 0.0  ;;  %v861_v42 = vmul.f32 %v1472_v24, %v860_v34  ;;  %v844_v25 = vmul.f32 %v1474_v35, %v645_v13  ;;  %vm849_vm3 = vweird.f32 %v1474_v35  ;;  %v906_v34 = vld [vmem:[%s1939_s3 + $0x10] sm:$0xff] }
 0x191   : > { %983 = vperm.xlu0 %1444, %v897_v41   ;;  %v837_v54 = vand.u32 2147483647, %v644_v29  ;;  %v839_v40 = vand.u32 2147483648, %v644_v29  ;;  %vm2334_vm4 = vmor %vm848_vm2, %vm849_vm3  ;;  %vm853_vm6 = vcmp.eq.f32.partialorder %v852_v49, 8.507059e+37  ;;  %v855_v59 = vor.u32 1.1754944e-38, %v854_v46 }
 0x192   : > { %v862_v17 = vadd.f32 %v1472_v24, %v861_v42  ;;  %v845_v50 = vsub.f32 1.0, %v844_v25  ;;  %v1476_v52 = vpop.eup %1475  ;;  %vm833_vm7 = vweird.f32 %v644_v29  ;;  %vm629_vm8 = vcmp.gt.f32.partialorder %v2263_v51, 0.0 }
 0x193   : > { %v829_v56 = vmul.f32 %v1476_v52, %v644_v29  ;;  %vm834_vm5 = vweird.f32 %v1476_v52  ;;  %vm2339_vm10 = vcmp.eq.f32.partialorder %v837_v54, 8.507059e+37  ;;  %v840_v63 = vor.u32 1.1754944e-38, %v839_v40  ;;  %v928_v29 = vld [vmem:[#allocation2 + $0x40] sm:$0xff]  ;;  %v907_v54 = vld [vmem:[%s1939_s3 + $0x18] sm:$0xff] }
 0x194   : > { %v866_v38 = vsel %vm2325_vm15, %v1472_v24, %v862_v17  ;;  %v846_v55 = vmul.f32 %v1474_v35, %v845_v50  ;;  %vm835_vm9 = vmor %vm833_vm7, %vm834_vm5  ;;  %vm878_vm14 = vweird.f32 %v647_v37  ;;  %v882_v5 = vand.u32 2147483647, %v647_v37  ;;  %v909_v24 = vld [vmem:[%s1939_s3 + $0x28] sm:$0xff]  ;;  %v923_v17 = vld [vmem:[#allocation2 + $0x18] sm:$0xff] }
 0x195   : > { %v871_v57 = vsel %vm2321_vm11, %v870_v47, %v866_v38  ;;  %v830_v48 = vsub.f32 1.0, %v829_v56  ;;  %v1478_v0 = vpop.eup %1477  ;;  %v884_v7 = vand.u32 2147483648, %v647_v37  ;;  %vm628_vm1 = vcmp.gt.f32.partialorder %v2292_v18, 0.0  ;;  %v924_v18 = vld [vmem:[#allocation2 + $0x50] sm:$0xff]  ;;  %v915_v47 = vld [vmem:[%s1939_s3 + $0x58] sm:$0xff]  ;;  %v921_v50 = vld [vmem:[#allocation2] sm:$0xff] }
 0x196   : > { %v902_v61 = vsel %vm630_vm12, %v871_v57, 0.0  ;;  %v847_v62 = vadd.f32 %v1474_v35, %v846_v55  ;;  %v874_v4 = vmul.f32 %v1478_v0, %v647_v37  ;;  %vm879_vm0 = vweird.f32 %v1478_v0  ;;  %v904_v37 = vld [vmem:[%s1939_s3] sm:$0xff]  ;;  %v905_v56 = vld [vmem:[%s1939_s3 + $0x8] sm:$0xff] }
 0x197   : > { %1008 = vperm.xlu2 %1446, %v902_v61   ;;  %v831_v3 = vmul.f32 %v1476_v52, %v830_v48  ;;  %vm880_vm13 = vmor %vm878_vm14, %vm879_vm0  ;;  %v885_v11 = vor.u32 1.1754944e-38, %v884_v7  ;;  %vm883_vm11 = vcmp.eq.f32.partialorder %v882_v5, 8.507059e+37  ;;  %vm631_vm15 = vcmp.gt.f32.partialorder %v2313_v32, 0.0  ;;  %v934_v61 = vld [vmem:[#allocation2 + $0x78] sm:$0xff]  ;;  %v910_v5 = vld [vmem:[%s1939_s3 + $0x30] sm:$0xff] }
 0x198   : > { %v851_v2 = vsel %vm2334_vm4, %v1474_v35, %v847_v62  ;;  %v875_v60 = vsub.f32 1.0, %v874_v4  ;;  %v918_v62 = vld [vmem:[%s1939_s3 + $0x70] sm:$0xff] }
 0x199   : > { %v856_v39 = vsel %vm853_vm6, %v855_v59, %v851_v2  ;;  %v832_v8 = vadd.f32 %v1476_v52, %v831_v3  ;;  %v927_v2 = vld [vmem:[#allocation2 + $0x48] sm:$0xff] }
 0x19a   : > { %v901_v44 = vsel %vm629_vm8, %v856_v39, 0.0  ;;  %v876_v53 = vmul.f32 %v1478_v0, %v875_v60  ;;  %v926_v3 = vld [vmem:[#allocation2 + $0x8] sm:$0xff] }
 0x19b   : > { %1003 = vperm.xlu1 %1445, %v901_v44   ;;  %v836_v51 = vsel %vm835_vm9, %v1476_v52, %v832_v8 }
 0x19c   : > { %v841_v10 = vsel %vm2339_vm10, %v840_v63, %v836_v51  ;;  %v877_v13 = vadd.f32 %v1478_v0, %v876_v53  ;;  %v911_v63 = vld [vmem:[%s1939_s3 + $0x38] sm:$0xff]  ;;  %v930_v51 = vld [vmem:[#allocation2 + $0x10] sm:$0xff] }
 0x19d   : > { %v900_v12 = vsel %vm628_vm1, %v841_v10, 0.0  ;;  %v914_v53 = vld [vmem:[%s1939_s3 + $0x50] sm:$0xff] }
 0x19e   : > { %998 = vperm.xlu0 %1444, %v900_v12   ;;  %v881_v14 = vsel %vm880_vm13, %v1478_v0, %v877_v13  ;;  %v929_v12 = vld [vmem:[#allocation2 + $0x20] sm:$0xff] }
 0x19f   : > { %v886_v15 = vsel %vm883_vm11, %v885_v11, %v881_v14  ;;  %v913_v14 = vld [vmem:[%s1939_s3 + $0x48] sm:$0xff] }
 0x1a0   : > { %v903_v16 = vsel %vm631_vm15, %v886_v15, 0.0 }
 0x1a6   : > { %1013 = vperm.xlu0 %1444, %v903_v16  }
 0x1c9   : > { %v959_v20 = vpop.permute.xlu2 %958 }
 0x1ca   : > { %v1020_v21 = vmul.f32 %v959_v20, %v924_v18  ;;  %v917_v20 = vld [vmem:[%s1939_s3 + $0x68] sm:$0xff] }
 0x1cc   : > { %v1036_v22 = vadd.f32 %v1020_v21, %v908_v19  ;;  %v933_v19 = vld [vmem:[#allocation2 + $0x70] sm:$0xff] }
 0x1ce   : > { %1052 = vst [vmem:[%s1939_s3 + $0x20] sm:$0xff] %v1036_v22 }
 0x1d1   : > { %v964_v26 = vpop.permute.xlu2 %963 }
 0x1d2   : > { %v1021_v27 = vmul.f32 %v964_v26, %v925_v23  ;;  %v932_v23 = vld [vmem:[#allocation2 + $0x60] sm:$0xff] }
 0x1d3   : > { %v916_v26 = vld [vmem:[%s1939_s3 + $0x60] sm:$0xff] }
 0x1d4   : > { %v1037_v28 = vadd.f32 %v1021_v27, %v909_v24 }
 0x1d6   : > { %1053 = vst [vmem:[%s1939_s3 + $0x28] sm:$0xff] %v1037_v28 }
 0x1d9   : > { %v979_v30 = vpop.permute.xlu2 %978 }
 0x1da   : > { %v1024_v31 = vmul.f32 %v979_v30, %v928_v29  ;;  %v919_v30 = vld [vmem:[%s1939_s3 + $0x78] sm:$0xff] }
 0x1dc   : > { %v1040_v32 = vadd.f32 %v1024_v31, %v912_v6  ;;  %v935_v6 = vld [vmem:[#allocation2 + $0x28] sm:$0xff] }
 0x1de   : > { %1056 = vst [vmem:[%s1939_s3 + $0x40] sm:$0xff] %v1040_v32 }
 0x1e2   : > { %v949_v35 = vpop.permute.xlu1 %948 }
 0x1e3   : > { %v1018_v36 = vmul.f32 %v949_v35, %v922_v9  ;;  %v939_v41 = vpop.permute.xlu0 %938 }
 0x1e4   : > { %v1016_v42 = vmul.f32 %v939_v41, %v920_v33  ;;  %v994_v49 = vpop.permute.xlu2 %993 }
 0x1e5   : > { %v1034_v25 = vadd.f32 %v1018_v36, %v906_v34  ;;  %v1027_v46 = vmul.f32 %v994_v49, %v931_v43 }
 0x1e6   : > { %v1032_v45 = vadd.f32 %v1016_v42, %v904_v37 }
 0x1e7   : > { %1050 = vst [vmem:[%s1939_s3 + $0x10] sm:$0xff] %v1034_v25  ;;  %v1043_v52 = vadd.f32 %v1027_v46, %v915_v47 }
 0x1e8   : > { %1048 = vst [vmem:[%s1939_s3] sm:$0xff] %v1032_v45 }
 0x1e9   : > { %1059 = vst [vmem:[%s1939_s3 + $0x58] sm:$0xff] %v1043_v52 }
 0x1ea   : > { %v954_v38 = vpop.permute.xlu1 %953 }
 0x1eb   : > { %v1019_v55 = vmul.f32 %v954_v38, %v923_v17  ;;  %v944_v40 = vpop.permute.xlu0 %943 }
 0x1ec   : > { %v1017_v57 = vmul.f32 %v944_v40, %v921_v50 }
 0x1ed   : > { %v1035_v58 = vadd.f32 %v1019_v55, %v907_v54 }
 0x1ee   : > { %v1033_v59 = vadd.f32 %v1017_v57, %v905_v56 }
 0x1ef   : > { %1051 = vst [vmem:[%s1939_s3 + $0x18] sm:$0xff] %v1035_v58 }
 0x1f0   : > { %1049 = vst [vmem:[%s1939_s3 + $0x8] sm:$0xff] %v1033_v59 }
 0x1f1   : > { %v1009_v48 = vpop.permute.xlu2 %1008 }
 0x1f2   : > { %v1030_v0 = vmul.f32 %v1009_v48, %v934_v61 }
 0x1f4   : > { %v1046_v1 = vadd.f32 %v1030_v0, %v918_v62 }
 0x1f6   : > { %1062 = vst [vmem:[%s1939_s3 + $0x70] sm:$0xff] %v1046_v1 }
 0x1f7   : > { %v974_v4 = vpop.permute.xlu1 %973 }
 0x1f8   : > { %v1023_v39 = vmul.f32 %v974_v4, %v927_v2  ;;  %v969_v7 = vpop.permute.xlu0 %968 }
 0x1f9   : > { %v1022_v44 = vmul.f32 %v969_v7, %v926_v3 }
 0x1fa   : > { %v1039_v8 = vadd.f32 %v1023_v39, %v911_v63 }
 0x1fb   : > { %v1038_v60 = vadd.f32 %v1022_v44, %v910_v5 }
 0x1fc   : > { %1055 = vst [vmem:[%s1939_s3 + $0x38] sm:$0xff] %v1039_v8 }
 0x1fd   : > { %1054 = vst [vmem:[%s1939_s3 + $0x30] sm:$0xff] %v1038_v60 }
 0x1ff   : > { %v989_v10 = vpop.permute.xlu1 %988 }
 0x200   : > { %v1026_v11 = vmul.f32 %v989_v10, %v930_v51 }
 0x202   : > { %v1042_v13 = vadd.f32 %v1026_v11, %v914_v53 }
 0x203   : > { %v984_v15 = vpop.permute.xlu0 %983 }
 0x204   : > { %1058 = vst [vmem:[%s1939_s3 + $0x50] sm:$0xff] %v1042_v13  ;;  %v1025_v16 = vmul.f32 %v984_v15, %v929_v12 }
 0x206   : > { %v1041_v18 = vadd.f32 %v1025_v16, %v913_v14 }
 0x208   : > { %1057 = vst [vmem:[%s1939_s3 + $0x48] sm:$0xff] %v1041_v18 }
 0x20d   : > { %v1004_v21 = vpop.permute.xlu1 %1003 }
 0x20e   : > { %v1029_v22 = vmul.f32 %v1004_v21, %v933_v19 }
 0x210   : > { %v1045_v24 = vadd.f32 %v1029_v22, %v917_v20  ;;  %v999_v27 = vpop.permute.xlu0 %998 }
 0x211   : > { %v1028_v28 = vmul.f32 %v999_v27, %v932_v23 }
 0x212   : > { %1061 = vst [vmem:[%s1939_s3 + $0x68] sm:$0xff] %v1045_v24 }
 0x213   : > { %v1044_v29 = vadd.f32 %v1028_v28, %v916_v26 }
 0x215   : > { %1060 = vst [vmem:[%s1939_s3 + $0x60] sm:$0xff] %v1044_v29 }
 0x218   : > { %v1014_v31 = vpop.permute.xlu0 %1013 }
 0x219   : > { %v1031_v32 = vmul.f32 %v1014_v31, %v935_v6 }
 0x21b   : > { %v1047_v9 = vadd.f32 %v1031_v32, %v919_v30 }
 0x21d   : > { %1063 = vst [vmem:[%s1939_s3 + $0x78] sm:$0xff] %v1047_v9 }
 0x21e PF: > { %s2548_s27 = sld [smem:[#allocation18_spill]]  ;;  %s1077_s0 = sshll.u32 %s1939_s3, 4  ;;  %s1078_s0 = int_to_ptr.vmem [resolvable:$true] %s1077_s0 }
 0x21f   : > { %s2550_s18 = sld [smem:[#allocation25_spill]]  ;;  %s1065_s23 = scalar_lea.sflag [#allocation6], %s230_s12 }
 0x224   : > { %s1262_s5 = sshll.u32 %s2548_s27, 7 }
 0x225   : > { %s2551_s8 = smov %s2550_s18  ;;  %s1076_s4 = scalar_lea.hbm %s2550_s18, %s1262_s5 }
 0x226   : > { %s1079_s9 = sshll.u32 %s1076_s4, 4  ;;  %s1559_s6 = scalar_lea.hbm %s2551_s8, 256  ;;  %s1080_s9 = int_to_ptr.hbm [resolvable:$true] %s1079_s9 }
 0x227   : > { %s1553_s30 = sshra.s32 %s1080_s9, 4  ;;  %s1554_s30 = int_to_ptr.hbm [resolvable:$true] %s1553_s30 }
 0x228   : > { %s1555_s20 = scalar_lea.hbm %s1554_s30, 128  ;;  %p1560_p11 = scmp.lt.s32.totalorder %s1554_s30, %s2551_s8 }
 0x229   : > { %p1556_p8 = scmp.ne.s32.totalorder %s1554_s30, %s1555_s20  ;;  %p1561_p4 = scmp.lt.s32.totalorder %s1559_s6, %s1555_s20 }
 0x22b   : > { %p1557_p9 = pnand %p1556_p8, %p1901_p12  ;;  %p1562_p1 = por %p1561_p4, %p1560_p11 }
 0x22d   : > { %p1558_p10 = pneg %p1557_p9 }
 0x22f   : > { %p1563_p0 = pnand %p1562_p1, %p1558_p10 }
 0x231   : > { %1566 = shalt.err (!%p1563_p0)
}
 0x232   : > { %s1715_s12 = smov 128   ;;  %s1716_s3 = smov 8  }
 0x233   : > { %1291 = dma.vmem_to_hbm [thread:$0]  (%p1901_p12), %s1078_s0, 2048, %s1080_s9, %s1065_s23, %s1715_s12, %s1715_s12, %s1716_s3  }
 0x234 PF: > { %s2552_s28 = sld [smem:[#allocation13_spill]]  ;;  %p1305_p7 = scmp.ge.s32.totalorder %s1705_s24, 2 }
 0x236   : > { %p1301_p13 = pnand %p1305_p7, %p1907_p2 }
 0x238   : > { %p1302_p3 = pneg %p1301_p13 }
 0x23a   : > { %s1094_s5 = sand.u32 1, %s2552_s28  }
 0x23b   : > { %s1095_s25 = scalar_lea.sflag [#allocation6], %s1094_s5 }
 0x23c   : > { %1640 = dma.done.wait (%p1302_p3), %s1095_s25, 2048  }
 0x23d   : > { %1642 = vsyncadd (%p1302_p3), %s1095_s25, 4294965248  ;;  %s21_s24 = sadd.s32 1, %s1705_s24   ;;  %s2554_s9 = sld [smem:[#allocation14_spill]] }
 0x23e   : > { %p2403_p5 = scmp.ge.s32.totalorder %s21_s24, 18   ;;  %s2555_s15 = smov %s1883_s10 }
 0x23f   : > { %s2556_s20 = sld [smem:[#allocation19_spill]]  ;;  %s2561_s10 = smov %s1653_s11 }
 0x240   : > { %s2557_s2 = sld [smem:[#allocation20_spill]]  ;;  %s2562_s11 = smov %s1851_s19 }
 0x241   : > { %s2558_s4 = sld [smem:[#allocation21_spill]]  ;;  %s2563_s12 = smov %s1661_s13 }
 0x242   : > { %s2559_s23 = sld [smem:[#allocation22_spill]]  ;;  %s2564_s13 = smov %s1665_s14 }
 0x243   : > { %s2565_s14 = smov %s2555_s15  ;;  %s2566_s15 = smov %s1673_s16 }
 0x244   : > { %s2567_s16 = smov %s1677_s17  ;;  %s2568_s17 = smov %s1854_s26 }
 0x245   : > { %s2569_s18 = smov %s1693_s21  ;;  %s2570_s19 = smov %s1697_s22 }
 0x246   : > { %s2571_s21 = smov %s2557_s2  ;;  %20 = sbr.rel (!%p2403_p5) target bundleno = 17 (0x11), region = 98 }
 0x247   : > { %s2572_s22 = smov %s2558_s4 }
 0x24b   :  { %1101 = vsyncpa [#allocation5], 1 }
 0x24c   :  { %1103 = vsyncpa [#allocation5 + $0x1], 1 }
 0x24d   :  { %1104 = vsyncpa [#allocation8], 1 }
 0x24e   :  { %1106 = vsyncpa [#allocation8 + $0x1], 1 }
 0x24f   :  { %1107 = vsyncpa [#allocation6], 1 }
 0x250   :  { %1109 = vsyncpa [#allocation6 + $0x1], 1 }

</bundles_post_ra>
